<compile_context>
chip_gen: v6e
topology: v6e:2x2x1
jax: 0.10.0
libtpu: 0.0.40
codegen_flags: <defaults>
</compile_context>

<pallas_src>
import functools

import jax
import jax.numpy as jnp
from jax.experimental import pallas as pl
from jax.experimental.pallas import tpu as pltpu

BN_EPS = 1e-5


# --------------------------------------------------------------------------
# Shared BN math
# --------------------------------------------------------------------------
def _bn_relu_from_moments(h, s, sq, n, gamma, beta):
    """BatchNorm1d (training mode, biased var) + ReLU from precomputed sums."""
    inv_n = 1.0 / n
    mean = s * inv_n
    # Clamp: f32 cancellation in E[h^2]-E[h]^2 can go slightly negative.
    var = jnp.maximum(sq * inv_n - mean * mean, 0.0)
    inv = jax.lax.rsqrt(var + BN_EPS)
    scale = gamma * inv
    shift = beta - mean * scale
    return jnp.maximum(h * scale + shift, 0.0)


def _bn_relu_train(h, gamma, beta):
    s = jnp.sum(h, axis=0, keepdims=True)
    sq = jnp.sum(h * h, axis=0, keepdims=True)
    return _bn_relu_from_moments(h, s, sq, h.shape[0], gamma, beta)


# --------------------------------------------------------------------------
# Small-batch kernel: whole batch resident in VMEM, no grid.
# --------------------------------------------------------------------------
def _resident_kernel(x_ref, w1_ref, w2_ref, s1_ref, s2_ref, o_ref):
    # Layer 1: Linear(1536 -> 384) (bias cancelled by BN) + BN + ReLU.
    h1 = jnp.dot(x_ref[...], w1_ref[...], preferred_element_type=jnp.float32)
    h1 = _bn_relu_train(h1, s1_ref[0:1, :], s1_ref[1:2, :])

    # Layer 2: Linear(384 -> 96, lane-padded to 128) + BN + ReLU.
    h2 = jnp.dot(h1.astype(jnp.bfloat16), w2_ref[...],
                 preferred_element_type=jnp.float32)
    h2 = _bn_relu_train(h2, s2_ref[0:1, :], s2_ref[1:2, :])

    # Layer 3: Linear(96 -> 1) as VPU multiply + lane reduction (no N=1 matmul).
    w3_row = s2_ref[2:3, :]
    b3 = s2_ref[3:4, :][:, 0:1]
    h3 = jnp.sum(h2 * w3_row, axis=-1, keepdims=True) + b3
    o_ref[...] = jax.nn.sigmoid(h3)


# --------------------------------------------------------------------------
# Large-batch kernel: batch-tiled grid, weights VMEM-resident, 3-phase BN.
#   phase 0: accumulate BN1 sum/sumsq
#   phase 1: accumulate BN2 sum/sumsq (recomputes layer 1)
#   phase 2: normalize + project + sigmoid (recomputes layers 1 & 2)
# --------------------------------------------------------------------------
def _make_tiled_kernel(batch_total):
    def kernel(x_ref, w1_ref, w2_ref, s1_ref, s2_ref, o_ref, mom1_ref, mom2_ref):
        phase = pl.program_id(0)
        tile = pl.program_id(1)

        @pl.when(jnp.logical_and(phase == 0, tile == 0))
        def _init():
            mom1_ref[...] = jnp.zeros_like(mom1_ref)
            mom2_ref[...] = jnp.zeros_like(mom2_ref)

        # Layer 1 recomputed every phase; weights stay VMEM-resident, x tile
        # is re-streamed (cheaper/safer than stashing activations in HBM).
        h1 = jnp.dot(x_ref[...], w1_ref[...], preferred_element_type=jnp.float32)

        @pl.when(phase == 0)
        def _accum_bn1():
            mom1_ref[0:1, :] += jnp.sum(h1, axis=0, keepdims=True)
            mom1_ref[1:2, :] += jnp.sum(h1 * h1, axis=0, keepdims=True)

        @pl.when(phase > 0)
        def _phase_1_2():
            h1n = _bn_relu_from_moments(
                h1, mom1_ref[0:1, :], mom1_ref[1:2, :], batch_total,
                s1_ref[0:1, :], s1_ref[1:2, :])
            h2 = jnp.dot(h1n.astype(jnp.bfloat16), w2_ref[...],
                         preferred_element_type=jnp.float32)

            @pl.when(phase == 1)
            def _accum_bn2():
                mom2_ref[0:1, :] += jnp.sum(h2, axis=0, keepdims=True)
                mom2_ref[1:2, :] += jnp.sum(h2 * h2, axis=0, keepdims=True)

            @pl.when(phase == 2)
            def _finalize():
                h2n = _bn_relu_from_moments(
                    h2, mom2_ref[0:1, :], mom2_ref[1:2, :], batch_total,
                    s2_ref[0:1, :], s2_ref[1:2, :])
                w3_row = s2_ref[2:3, :]
                b3 = s2_ref[3:4, :][:, 0:1]
                h3 = jnp.sum(h2n * w3_row, axis=-1, keepdims=True) + b3
                o_ref[...] = jax.nn.sigmoid(h3)

    return kernel


# --------------------------------------------------------------------------
# Host-side wrappers
# --------------------------------------------------------------------------
def _vmem_budget_bytes():
    """Scoped-VMEM budget: ~3/4 of physical VMEM, conservative fallback."""
    try:
        cap = int(pltpu.get_tpu_info().vmem_capacity_bytes)
    except Exception:
        cap = 64 * 1024 * 1024  # v7x per-TC capacity: safe everywhere
    return max(32 * 1024 * 1024, min(cap * 3 // 4, 96 * 1024 * 1024))


def _auto_batch_tile(batch, budget):
    """None -> resident block; otherwise batch-tile size for the tiled grid."""
    per_row = 1536 * 2 + 384 * 4 + 128 * 4 + 4  # bf16 x + f32 h1/h2 + out
    if batch * per_row <= budget // 2:          # resident block fits comfortably
        return None
    for tb in (1024, 512, 256, 128):
        if batch % tb == 0:
            return tb
    return None  # fall back to resident block if no clean divisor


def _resident_forward(x, w1, w2, slab1, slab2, vmem_limit):
    batch = x.shape[0]
    vmem = pl.BlockSpec(memory_space=pltpu.MemorySpace.VMEM)
    return pl.pallas_call(
        _resident_kernel,
        out_shape=jax.ShapeDtypeStruct((batch, 1), jnp.float32),
        in_specs=[vmem] * 5,
        out_specs=vmem,
        compiler_params=pltpu.CompilerParams(vmem_limit_bytes=vmem_limit),
    )(x, w1, w2, slab1, slab2)


def _tiled_forward(x, w1, w2, slab1, slab2, batch_tile, vmem_limit):
    batch = x.shape[0]
    n_tiles = batch // batch_tile
    kernel = _make_tiled_kernel(batch)
    grid_spec = pltpu.PrefetchScalarGridSpec(
        num_scalar_prefetch=0,
        grid=(3, n_tiles),
        in_specs=[
            pl.BlockSpec((batch_tile, 1536), lambda p, t: (t, 0)),
            # Constant block index -> weights/slabs DMA'd once, VMEM-resident.
            pl.BlockSpec((1536, 384), lambda p, t: (0, 0)),
            pl.BlockSpec((384, 128), lambda p, t: (0, 0)),
            pl.BlockSpec((2, 384), lambda p, t: (0, 0)),
            pl.BlockSpec((4, 128), lambda p, t: (0, 0)),
        ],
        out_specs=pl.BlockSpec((batch_tile, 1), lambda p, t: (t, 0)),
        scratch_shapes=[pltpu.VMEM((2, 384), jnp.float32),
                        pltpu.VMEM((2, 128), jnp.float32)],
    )
    return pl.pallas_call(
        kernel,
        out_shape=jax.ShapeDtypeStruct((batch, 1), jnp.float32),
        grid_spec=grid_spec,
        compiler_params=pltpu.CompilerParams(
            # Both axes carry the moment accumulators -> sequential.
            dimension_semantics=("arbitrary", "arbitrary"),
            vmem_limit_bytes=vmem_limit,
        ),
    )(x, w1, w2, slab1, slab2)


def vit_head_forward(x, packed, batch_tile=None):
    w1, w2, slab1, slab2 = packed
    batch = x.shape[0]
    assert batch >= 2, "training-mode BatchNorm1d needs batch size >= 2"
    if x.dtype != jnp.bfloat16:
        # Fallback only; ideally the backbone emits bf16 so this is fused away.
        x = x.astype(jnp.bfloat16)
    budget = _vmem_budget_bytes()
    if batch_tile is None:
        batch_tile = _auto_batch_tile(batch, budget)
    if batch_tile is None:
        return _resident_forward(x, w1, w2, slab1, slab2, budget)
    assert batch % batch_tile == 0 and batch_tile % 128 == 0
    return _tiled_forward(x, w1, w2, slab1, slab2, batch_tile, budget)


def prepare_params(p):
    """Pack PyTorch-layout params into kernel-friendly slabs (done ONCE)."""
    w1 = p["w1t"].astype(jnp.bfloat16)                                    # (1536, 384)

    # Layer-2 weights / affine lane-padded 96 -> 128 with zeros.
    w2 = jnp.zeros((384, 128), jnp.bfloat16).at[:, :96].set(
        p["w2t"].astype(jnp.bfloat16))
    g2 = jnp.zeros((1, 128), jnp.float32).at[:, :96].set(p["g2"])          # pad gamma = 0
    be2 = jnp.zeros((1, 128), jnp.float32).at[:, :96].set(p["be2"])
    w3_row = jnp.zeros((1, 128), jnp.float32).at[:, :96].set(p["w3t"].T)
    b3_row = jnp.full((1, 128), p["b3"][0, 0], jnp.float32)

    slab1 = jnp.concatenate([p["g1"], p["be1"]], axis=0)                   # (2, 384)
    slab2 = jnp.concatenate([g2, be2, w3_row, b3_row], axis=0)             # (4, 128)
    return w1, w2, slab1, slab2


class ViTHead:
    """Packs weights once; per-call work is only the pallas_call itself."""

    def __init__(self, params):
        self.packed = tuple(jax.device_put(a) for a in prepare_params(params))
        self._fwd = jax.jit(vit_head_forward, static_argnames=("batch_tile",))

    def __call__(self, x, batch_tile=None):
        return self._fwd(x, self.packed, batch_tile=batch_tile)


# --------------------------------------------------------------------------
# Parameter init + references
# --------------------------------------------------------------------------
def init_params(key):
    """Deterministic parameter init (shapes match the PyTorch module)."""
    k1, k2, k3 = jax.random.split(key, 3)

    def linear(k, fan_in, fan_out):
        bound = 1.0 / jnp.sqrt(fan_in)
        kw, kb = jax.random.split(k)
        w_t = jax.random.uniform(kw, (fan_in, fan_out), jnp.float32, -bound, bound)
        b = jax.random.uniform(kb, (1, fan_out), jnp.float32, -bound, bound)
        return w_t, b

    w1t, b1 = linear(k1, 1536, 384)
    w2t, b2 = linear(k2, 384, 96)
    w3t, b3 = linear(k3, 96, 1)
    return dict(
        w1t=w1t, b1=b1,
        g1=jnp.ones((1, 384), jnp.float32), be1=jnp.zeros((1, 384), jnp.float32),
        w2t=w2t, b2=b2,
        g2=jnp.ones((1, 96), jnp.float32), be2=jnp.zeros((1, 96), jnp.float32),
        w3t=w3t, b3=b3,
    )


def reference_matched(x, w1, w2, slab1, slab2):
    """Pure-JAX reference mirroring the kernel math (bf16 matmuls, padded L2)."""
    h1 = jnp.dot(x.astype(jnp.bfloat16), w1, preferred_element_type=jnp.float32)
    h1 = _bn_relu_train(h1, slab1[0:1, :], slab1[1:2, :])
    h2 = jnp.dot(h1.astype(jnp.bfloat16), w2, preferred_element_type=jnp.float32)
    h2 = _bn_relu_train(h2, slab2[0:1, :], slab2[1:2, :])
    h3 = jnp.sum(h2 * slab2[2:3, :], axis=-1, keepdims=True) + slab2[3:4, 0:1]
    return jax.nn.sigmoid(h3)


def reference_pytorch_f32(x, p):
    """Straight f32 transcription of the PyTorch head (biases included)."""
    def bn(h, g, b):
        m = jnp.mean(h, axis=0, keepdims=True)
        v = jnp.mean((h - m) ** 2, axis=0, keepdims=True)
        return (h - m) / jnp.sqrt(v + BN_EPS) * g + b

    h = jnp.maximum(bn(x @ p["w1t"] + p["b1"], p["g1"], p["be1"]), 0.0)
    h = jnp.maximum(bn(h @ p["w2t"] + p["b2"], p["g2"], p["be2"]), 0.0)
    return jax.nn.sigmoid(h @ p["w3t"] + p["b3"])


if __name__ == "__main__":
    key = jax.random.PRNGKey(0)
    kx, kx2, kp = jax.random.split(key, 3)

    params = init_params(kp)
    head = ViTHead(params)

    # ---- small batch: resident-block path ---------------------------------
    B = 8  # training-mode BatchNorm1d needs batch > 1
    x = jax.random.normal(kx, (B, 1536), dtype=jnp.float32).astype(jnp.bfloat16)
    out = jax.block_until_ready(head(x))
    assert out.shape == (B, 1), out.shape

    ref_m = reference_matched(x, *head.packed)
    assert jnp.allclose(out, ref_m, atol=1e-3, rtol=1e-3), (out, ref_m)

    ref_f32 = reference_pytorch_f32(x.astype(jnp.float32), params)
    assert jnp.allclose(out, ref_f32, atol=5e-2, rtol=5e-2), (out, ref_f32)

    # ---- larger batch: exercise the batch-tiled 3-phase-BN path ------------
    B2 = 256
    x2 = jax.random.normal(kx2, (B2, 1536), dtype=jnp.float32).astype(jnp.bfloat16)
    out2 = jax.block_until_ready(head(x2, batch_tile=128))
    assert out2.shape == (B2, 1), out2.shape
    ref2 = reference_matched(x2, *head.packed)
    assert jnp.allclose(out2, ref2, atol=5e-3, rtol=5e-3), (out2, ref2)

    print("KERNEL_OK")
</pallas_src>

<mosaic_0001>
module attributes {stable_mosaic.version = 11 : i64} {
  func.func @_resident_kernel(%arg0: memref<8x1536xbf16, #tpu.memory_space<vmem>>, %arg1: memref<1536x384xbf16, #tpu.memory_space<vmem>>, %arg2: memref<384x128xbf16, #tpu.memory_space<vmem>>, %arg3: memref<2x384xf32, #tpu.memory_space<vmem>>, %arg4: memref<4x128xf32, #tpu.memory_space<vmem>>, %arg5: memref<8x1xf32, #tpu.memory_space<vmem>>) attributes {dimension_semantics = [], scalar_prefetch = 0 : i64, scratch_operands = 0 : i64, tpu.core_type = #tpu.core_type<tc>} {
    %c0 = arith.constant 0 : index
    %c0_0 = arith.constant 0 : index
    %0 = vector.load %arg0[%c0, %c0_0] : memref<8x1536xbf16, #tpu.memory_space<vmem>>, vector<8x1536xbf16>
    %c0_1 = arith.constant 0 : index
    %c0_2 = arith.constant 0 : index
    %1 = vector.load %arg1[%c0_1, %c0_2] : memref<1536x384xbf16, #tpu.memory_space<vmem>>, vector<1536x384xbf16>
    %cst = arith.constant dense<0.000000e+00> : vector<8x384xf32>
    %2 = tpu.matmul %0, %1, %cst {dimension_numbers = #tpu.dot_dimension_numbers<[1], [0], [0], [1], [0, 0, 1, 1], [], []>} : vector<8x1536xbf16>, vector<1536x384xbf16>, vector<8x384xf32> -> vector<8x384xf32>
    %c0_3 = arith.constant 0 : index
    %c0_4 = arith.constant 0 : index
    %3 = vector.load %arg3[%c0_3, %c0_4] : memref<2x384xf32, #tpu.memory_space<vmem>>, vector<1x384xf32>
    %c1 = arith.constant 1 : index
    %c0_5 = arith.constant 0 : index
    %4 = vector.load %arg3[%c1, %c0_5] : memref<2x384xf32, #tpu.memory_space<vmem>>, vector<1x384xf32>
    %cst_6 = arith.constant dense<0.000000e+00> : vector<384xf32>
    %5 = vector.multi_reduction <add>, %2, %cst_6 [0] : vector<8x384xf32> to vector<384xf32>
    %6 = vector.shape_cast %5 : vector<384xf32> to vector<1x384xf32>
    %7 = arith.mulf %2, %2 : vector<8x384xf32>
    %cst_7 = arith.constant dense<0.000000e+00> : vector<384xf32>
    %8 = vector.multi_reduction <add>, %7, %cst_7 [0] : vector<8x384xf32> to vector<384xf32>
    %9 = vector.shape_cast %8 : vector<384xf32> to vector<1x384xf32>
    %cst_8 = arith.constant 1.250000e-01 : f32
    %10 = vector.broadcast %cst_8 : f32 to vector<1x384xf32>
    %11 = arith.mulf %6, %10 : vector<1x384xf32>
    %cst_9 = arith.constant 1.250000e-01 : f32
    %12 = vector.broadcast %cst_9 : f32 to vector<1x384xf32>
    %13 = arith.mulf %9, %12 : vector<1x384xf32>
    %14 = arith.mulf %11, %11 : vector<1x384xf32>
    %15 = arith.subf %13, %14 : vector<1x384xf32>
    %cst_10 = arith.constant 0.000000e+00 : f32
    %16 = vector.broadcast %cst_10 : f32 to vector<1x384xf32>
    %17 = arith.maximumf %15, %16 : vector<1x384xf32>
    %cst_11 = arith.constant 9.99999974E-6 : f32
    %18 = vector.broadcast %cst_11 : f32 to vector<1x384xf32>
    %19 = arith.addf %17, %18 : vector<1x384xf32>
    %20 = math.rsqrt %19 : vector<1x384xf32>
    %21 = arith.mulf %3, %20 : vector<1x384xf32>
    %22 = arith.mulf %11, %21 : vector<1x384xf32>
    %23 = arith.subf %4, %22 : vector<1x384xf32>
    %24 = vector.broadcast %21 : vector<1x384xf32> to vector<8x384xf32>
    %25 = arith.mulf %2, %24 : vector<8x384xf32>
    %26 = vector.broadcast %23 : vector<1x384xf32> to vector<8x384xf32>
    %27 = arith.addf %25, %26 : vector<8x384xf32>
    %cst_12 = arith.constant 0.000000e+00 : f32
    %28 = vector.broadcast %cst_12 : f32 to vector<8x384xf32>
    %29 = arith.maximumf %27, %28 : vector<8x384xf32>
    %30 = arith.truncf %29 : vector<8x384xf32> to vector<8x384xbf16>
    %c0_13 = arith.constant 0 : index
    %c0_14 = arith.constant 0 : index
    %31 = vector.load %arg2[%c0_13, %c0_14] : memref<384x128xbf16, #tpu.memory_space<vmem>>, vector<384x128xbf16>
    %cst_15 = arith.constant dense<0.000000e+00> : vector<8x128xf32>
    %32 = tpu.matmul %30, %31, %cst_15 {dimension_numbers = #tpu.dot_dimension_numbers<[1], [0], [0], [1], [0, 0, 1, 1], [], []>} : vector<8x384xbf16>, vector<384x128xbf16>, vector<8x128xf32> -> vector<8x128xf32>
    %c0_16 = arith.constant 0 : index
    %c0_17 = arith.constant 0 : index
    %33 = vector.load %arg4[%c0_16, %c0_17] : memref<4x128xf32, #tpu.memory_space<vmem>>, vector<1x128xf32>
    %c1_18 = arith.constant 1 : index
    %c0_19 = arith.constant 0 : index
    %34 = vector.load %arg4[%c1_18, %c0_19] : memref<4x128xf32, #tpu.memory_space<vmem>>, vector<1x128xf32>
    %cst_20 = arith.constant dense<0.000000e+00> : vector<128xf32>
    %35 = vector.multi_reduction <add>, %32, %cst_20 [0] : vector<8x128xf32> to vector<128xf32>
    %36 = vector.shape_cast %35 : vector<128xf32> to vector<1x128xf32>
    %37 = arith.mulf %32, %32 : vector<8x128xf32>
    %cst_21 = arith.constant dense<0.000000e+00> : vector<128xf32>
    %38 = vector.multi_reduction <add>, %37, %cst_21 [0] : vector<8x128xf32> to vector<128xf32>
    %39 = vector.shape_cast %38 : vector<128xf32> to vector<1x128xf32>
    %cst_22 = arith.constant 1.250000e-01 : f32
    %40 = vector.broadcast %cst_22 : f32 to vector<1x128xf32>
    %41 = arith.mulf %36, %40 : vector<1x128xf32>
    %cst_23 = arith.constant 1.250000e-01 : f32
    %42 = vector.broadcast %cst_23 : f32 to vector<1x128xf32>
    %43 = arith.mulf %39, %42 : vector<1x128xf32>
    %44 = arith.mulf %41, %41 : vector<1x128xf32>
    %45 = arith.subf %43, %44 : vector<1x128xf32>
    %cst_24 = arith.constant 0.000000e+00 : f32
    %46 = vector.broadcast %cst_24 : f32 to vector<1x128xf32>
    %47 = arith.maximumf %45, %46 : vector<1x128xf32>
    %cst_25 = arith.constant 9.99999974E-6 : f32
    %48 = vector.broadcast %cst_25 : f32 to vector<1x128xf32>
    %49 = arith.addf %47, %48 : vector<1x128xf32>
    %50 = math.rsqrt %49 : vector<1x128xf32>
    %51 = arith.mulf %33, %50 : vector<1x128xf32>
    %52 = arith.mulf %41, %51 : vector<1x128xf32>
    %53 = arith.subf %34, %52 : vector<1x128xf32>
    %54 = vector.broadcast %51 : vector<1x128xf32> to vector<8x128xf32>
    %55 = arith.mulf %32, %54 : vector<8x128xf32>
    %56 = vector.broadcast %53 : vector<1x128xf32> to vector<8x128xf32>
    %57 = arith.addf %55, %56 : vector<8x128xf32>
    %cst_26 = arith.constant 0.000000e+00 : f32
    %58 = vector.broadcast %cst_26 : f32 to vector<8x128xf32>
    %59 = arith.maximumf %57, %58 : vector<8x128xf32>
    %c2 = arith.constant 2 : index
    %c0_27 = arith.constant 0 : index
    %60 = vector.load %arg4[%c2, %c0_27] : memref<4x128xf32, #tpu.memory_space<vmem>>, vector<1x128xf32>
    %c3 = arith.constant 3 : index
    %c0_28 = arith.constant 0 : index
    %61 = vector.load %arg4[%c3, %c0_28] : memref<4x128xf32, #tpu.memory_space<vmem>>, vector<1x128xf32>
    %62 = vector.extract_strided_slice %61 {offsets = [0, 0], sizes = [1, 1], strides = [1, 1]} : vector<1x128xf32> to vector<1x1xf32>
    %63 = vector.broadcast %60 : vector<1x128xf32> to vector<8x128xf32>
    %64 = arith.mulf %59, %63 : vector<8x128xf32>
    %cst_29 = arith.constant dense<0.000000e+00> : vector<8xf32>
    %65 = vector.multi_reduction <add>, %64, %cst_29 [1] : vector<8x128xf32> to vector<8xf32>
    %66 = vector.shape_cast %65 : vector<8xf32> to vector<8x1xf32>
    %67 = vector.broadcast %62 : vector<1x1xf32> to vector<8x1xf32>
    %68 = arith.addf %66, %67 : vector<8x1xf32>
    %69 = arith.negf %68 : vector<8x1xf32>
    %70 = math.exp %69 : vector<8x1xf32>
    %cst_30 = arith.constant 1.000000e+00 : f32
    %71 = vector.broadcast %cst_30 : f32 to vector<8x1xf32>
    %72 = arith.addf %71, %70 : vector<8x1xf32>
    %73 = arith.divf %71, %72 : vector<8x1xf32>
    %c0_31 = arith.constant 0 : index
    %c0_32 = arith.constant 0 : index
    %74 = vector.load %arg5[%c0_31, %c0_32] : memref<8x1xf32, #tpu.memory_space<vmem>>, vector<8x1xf32>
    tpu.vector_store %arg5[%c0_31, %c0_32], %73 {strides = array<i32>} : memref<8x1xf32, #tpu.memory_space<vmem>>, vector<8x1xf32>,
    return
  }
}

</mosaic_0001>

<bundles_post_ra>
// kernel: vit_head_forward.1
= control target key start
LH: loop header
LB: loop body
LE: loop exit
PB: predicated region body
PF: predicated region fallthrough
CT: control target
= control target key end

     0   :  { %10 = vsyncpa [#allocation3], 0  ;;  %s4277_s0 = inlined_call_operand.hbm [shape: bf16[8,1536], index: 0, kind: input, shape index: {}]   ;;  %s4278_s1 = inlined_call_operand.hbm [shape: bf16[1536,384], index: 1, kind: input, shape index: {}]   ;;  %s4279_s2 = inlined_call_operand.hbm [shape: bf16[384,128], index: 2, kind: input, shape index: {}]   ;;  %s4280_s3 = inlined_call_operand.hbm [shape: f32[2,384], index: 3, kind: input, shape index: {}]   ;;  %s4281_s4 = inlined_call_operand.hbm [shape: f32[4,128], index: 4, kind: input, shape index: {}]   ;;  %s4282_s5 = inlined_call_operand.vmem [shape: f32[8,1], index: 5, kind: output, shape index: {}]  }
   0x1   :  { %11 = vsyncpa [#allocation5], 0 }
   0x2   :  { %12 = vsyncpa [#allocation8], 0  ;;  %s4100_s18 = smov [#allocation4]  }
   0x3   :  { %s28_s19 = sshll.u32 %s4100_s18, 4  ;;  %s29_s19 = int_to_ptr.vmem [resolvable:$true] %s28_s19 }
   0x4   :  { %s4002_s20 = scalar_lea.vmem %s29_s19, 36864  ;;  %p4007_p1 = scmp.lt.s32.totalorder %s29_s19, %s29_s19 }
   0x5   :  { %p4003_p0 = scmp.ne.s32.totalorder %s29_s19, %s4002_s20  ;;  %p4008_p2 = scmp.lt.s32.totalorder %s4002_s20, %s4002_s20 }
   0x7   :  { %p4009_p3 = por %p4008_p2, %p4007_p1 }
   0x9   :  { %p4010_p4 = pnand %p4009_p3, %p4003_p0 }
   0xb   :  { %4013 = shalt.err (!%p4010_p4)
}
   0xc   :  { %s4101_s21 = smov 192   ;;  %s4102_s22 = smov 12  }
   0xd   :  { %34 = dma.hbm_to_vmem [thread:$0]  %s4278_s1, 36864, %s29_s19, [#allocation5], %s4101_s21, %s4101_s21, %s4102_s22  }
   0xe   :  { %s4103_s25 = smov [#allocation7]   ;;  %s4104_s27 = smov [#allocation2]  }
   0xf   :  { %s53_s26 = sshll.u32 %s4103_s25, 4  ;;  %s19_s28 = sshll.u32 %s4104_s27, 4  ;;  %s54_s26 = int_to_ptr.vmem [resolvable:$true] %s53_s26  ;;  %s20_s28 = int_to_ptr.vmem [resolvable:$true] %s19_s28 }
  0x10   :  { %s4022_s29 = scalar_lea.vmem %s54_s26, 96  ;;  %p4027_p6 = scmp.lt.s32.totalorder %s54_s26, %s54_s26 }
  0x11   :  { %p4023_p5 = scmp.ne.s32.totalorder %s54_s26, %s4022_s29  ;;  %p4028_p7 = scmp.lt.s32.totalorder %s4022_s29, %s4022_s29 }
  0x13   :  { %p4029_p8 = por %p4028_p7, %p4027_p6 }
  0x15   :  { %p4030_p9 = pnand %p4029_p8, %p4023_p5 }
  0x17   :  { %4033 = shalt.err (!%p4030_p9)
}
  0x18   :  { %56 = dma.hbm_to_vmem [thread:$0]  %s4280_s3, 96, %s54_s26, [#allocation8]  }
  0x19   :  { %s4042_s7 = scalar_lea.vmem %s20_s28, 768  ;;  %p4047_p11 = scmp.lt.s32.totalorder %s20_s28, %s20_s28 }
  0x1a   :  { %p4043_p10 = scmp.ne.s32.totalorder %s20_s28, %s4042_s7  ;;  %p4048_p12 = scmp.lt.s32.totalorder %s4042_s7, %s4042_s7 }
  0x1c   :  { %p4049_p13 = por %p4048_p12, %p4047_p11 }
  0x1e   :  { %p4050_p0 = pnand %p4049_p13, %p4043_p10 }
  0x20   :  { %4053 = shalt.err (!%p4050_p0)
}
  0x21   :  { %22 = dma.hbm_to_vmem [thread:$0]  %s4277_s0, 768, %s20_s28, [#allocation3]  }
  0x22   :  { %s4105_s9 = smov [#allocation6]  }
  0x23   :  { %s40_s10 = sshll.u32 %s4105_s9, 4  ;;  %s41_s10 = int_to_ptr.vmem [resolvable:$true] %s40_s10 }
  0x24   :  { %s4062_s11 = scalar_lea.vmem %s41_s10, 3072  ;;  %p4067_p2 = scmp.lt.s32.totalorder %s41_s10, %s41_s10 }
  0x25   :  { %p4063_p1 = scmp.ne.s32.totalorder %s41_s10, %s4062_s11  ;;  %p4068_p3 = scmp.lt.s32.totalorder %s4062_s11, %s4062_s11 }
  0x27   :  { %p4069_p4 = por %p4068_p3, %p4067_p2 }
  0x29   :  { %p4070_p5 = pnand %p4069_p4, %p4063_p1 }
  0x2b   :  { %4073 = shalt.err (!%p4070_p5)
}
  0x2c   :  { %s4106_s3 = smov 64   ;;  %s4107_s12 = smov 4  }
  0x2d   :  { %46 = dma.hbm_to_vmem [thread:$0]  %s4279_s2, 3072, %s41_s10, [#allocation5], %s4106_s3, %s4106_s3, %s4107_s12  }
  0x2e   :  { %s4108_s15 = smov [#allocation9]  }
  0x2f   :  { %s63_s16 = sshll.u32 %s4108_s15, 4  ;;  %s64_s16 = int_to_ptr.vmem [resolvable:$true] %s63_s16 }
  0x30   :  { %s4082_s0 = scalar_lea.vmem %s64_s16, 64  ;;  %p4087_p7 = scmp.lt.s32.totalorder %s64_s16, %s64_s16 }
  0x31   :  { %p4083_p6 = scmp.ne.s32.totalorder %s64_s16, %s4082_s0  ;;  %p4088_p8 = scmp.lt.s32.totalorder %s4082_s0, %s4082_s0 }
  0x33   :  { %p4089_p9 = por %p4088_p8, %p4087_p7 }
  0x35   :  { %p4090_p10 = pnand %p4089_p9, %p4083_p6 }
  0x37   :  { %4093 = shalt.err (!%p4090_p10)
}
  0x38   :  { %66 = dma.hbm_to_vmem [thread:$0]  %s4281_s4, 64, %s64_s16, [#allocation8]  }
  0x39   :  { %4094 = dma.done.wait [#allocation3], 768  }
  0x3a   :  { %4095 = vsyncadd [#allocation3], 4294966528 }
  0x3b   :  { %4096 = dma.done.wait [#allocation5], 39936  }
  0x3c   :  { %4097 = vsyncadd [#allocation5], 4294927360 }
  0x3d   :  { %4098 = dma.done.wait [#allocation8], 160  }
  0x3e   :  { %4099 = vsyncadd [#allocation8], 4294967136  ;;  %v3562_v0 = vld [vmem:[#allocation4 + $0xac] ss:$12 sps:$4 sm:$0xff]   ;;  %v3566_v2 = vld [vmem:[#allocation4 + $0xa8] ss:$12 sps:$4 sm:$0xff]  }
  0x3f   :  { %v3564_v1 = vld [vmem:[#allocation4 + $0x22c] ss:$12 sps:$4 sm:$0xff]   ;;  %2051 = vmatprep.subr.bf16.mxu0 %v3562_v0  ;;  %v3567_v3 = vld [vmem:[#allocation4 + $0x228] ss:$12 sps:$4 sm:$0xff]   ;;  %v3572_v6 = vld [vmem:[#allocation4 + $0x90] ss:$12 sps:$4 sm:$0xff]  }
  0x40   :  { %2092 = vmatprep.subr.bf16.mxu1 %v3564_v1  ;;  %v3568_v4 = vld [vmem:[#allocation4 + $0x94] ss:$12 sps:$4 sm:$0xff]   ;;  %2052 = vmatpush1.bf16.msra.mxu0 %v3566_v2  ;;  %v3573_v7 = vld [vmem:[#allocation4 + $0x210] ss:$12 sps:$4 sm:$0xff]   ;;  %v3578_v10 = vld [vmem:[#allocation4 + $0x78] ss:$12 sps:$4 sm:$0xff]  }
  0x41   :  { %2093 = vmatpush1.bf16.msra.mxu1 %v3567_v3  ;;  %v3570_v5 = vld [vmem:[#allocation4 + $0x214] ss:$12 sps:$4 sm:$0xff]   ;;  %2053 = vmatprep.subr.bf16.mxu0 %v3568_v4  ;;  %v3574_v8 = vld [vmem:[#allocation4 + $0x7c] ss:$12 sps:$4 sm:$0xff]   ;;  %v3579_v11 = vld [vmem:[#allocation4 + $0x1f8] ss:$12 sps:$4 sm:$0xff]  }
  0x42   :  { %2094 = vmatprep.subr.bf16.mxu1 %v3570_v5  ;;  %v3576_v9 = vld [vmem:[#allocation4 + $0x1fc] ss:$12 sps:$4 sm:$0xff]   ;;  %v3580_v12 = vld [vmem:[#allocation4 + $0x64] ss:$12 sps:$4 sm:$0xff]   ;;  %v3584_v14 = vld [vmem:[#allocation4 + $0x60] ss:$12 sps:$4 sm:$0xff]  }
  0x43   :  { %v3582_v13 = vld [vmem:[#allocation4 + $0x1e4] ss:$12 sps:$4 sm:$0xff]   ;;  %v3585_v15 = vld [vmem:[#allocation4 + $0x1e0] ss:$12 sps:$4 sm:$0xff]   ;;  %v3590_v18 = vld [vmem:[#allocation4 + $0x48] ss:$12 sps:$4 sm:$0xff]  }
  0x44   :  { %2054 = vmatpush1.bf16.msra.mxu0 %v3572_v6  ;;  %v3586_v16 = vld [vmem:[#allocation4 + $0x4c] ss:$12 sps:$4 sm:$0xff]   ;;  %v3591_v19 = vld [vmem:[#allocation4 + $0x1c8] ss:$12 sps:$4 sm:$0xff]   ;;  %v3596_v22 = vld [vmem:[#allocation4 + $0x30] ss:$12 sps:$4 sm:$0xff]  }
  0x45   :  { %2095 = vmatpush1.bf16.msra.mxu1 %v3573_v7  ;;  %2055 = vmatprep.subr.bf16.mxu0 %v3574_v8  ;;  %v3588_v17 = vld [vmem:[#allocation4 + $0x1cc] ss:$12 sps:$4 sm:$0xff]   ;;  %v3592_v20 = vld [vmem:[#allocation4 + $0x34] ss:$12 sps:$4 sm:$0xff]   ;;  %v3597_v23 = vld [vmem:[#allocation4 + $0x1b0] ss:$12 sps:$4 sm:$0xff]  }
  0x46   :  { %2096 = vmatprep.subr.bf16.mxu1 %v3576_v9  ;;  %v3594_v21 = vld [vmem:[#allocation4 + $0x1b4] ss:$12 sps:$4 sm:$0xff]   ;;  %v3598_v24 = vld [vmem:[#allocation4 + $0x1c] ss:$12 sps:$4 sm:$0xff]   ;;  %v3602_v26 = vld [vmem:[#allocation4 + $0x18] ss:$12 sps:$4 sm:$0xff]  }
  0x47   :  { %v3600_v25 = vld [vmem:[#allocation4 + $0x19c] ss:$12 sps:$4 sm:$0xff]   ;;  %v3603_v27 = vld [vmem:[#allocation4 + $0x198] ss:$12 sps:$4 sm:$0xff]   ;;  %v3608_v30 = vld [vmem:[#allocation4] ss:$12 sps:$4 sm:$0xff]  }
  0x48   :  { %2056 = vmatpush1.bf16.msra.mxu0 %v3578_v10  ;;  %v3604_v28 = vld [vmem:[#allocation4 + $0x4] ss:$12 sps:$4 sm:$0xff]   ;;  %v3609_v31 = vld [vmem:[#allocation4 + $0x180] ss:$12 sps:$4 sm:$0xff]   ;;  %v3614_v34 = vld [vmem:[#allocation4 + $0x168] ss:$12 sps:$4 sm:$0xff]  }
  0x49   :  { %2097 = vmatpush1.bf16.msra.mxu1 %v3579_v11  ;;  %2057 = vmatprep.subr.bf16.mxu0 %v3580_v12  ;;  %v3606_v29 = vld [vmem:[#allocation4 + $0x184] ss:$12 sps:$4 sm:$0xff]   ;;  %v3610_v32 = vld [vmem:[#allocation4 + $0x16c] ss:$12 sps:$4 sm:$0xff]   ;;  %v3615_v35 = vld [vmem:[#allocation4 + $0x2e8] ss:$12 sps:$4 sm:$0xff]  }
  0x4a   :  { %2098 = vmatprep.subr.bf16.mxu1 %v3582_v13  ;;  %v3612_v33 = vld [vmem:[#allocation4 + $0x2ec] ss:$12 sps:$4 sm:$0xff]   ;;  %v3616_v36 = vld [vmem:[#allocation4 + $0x154] ss:$12 sps:$4 sm:$0xff]   ;;  %v3620_v38 = vld [vmem:[#allocation4 + $0x150] ss:$12 sps:$4 sm:$0xff]  }
  0x4b   :  { %v3618_v37 = vld [vmem:[#allocation4 + $0x2d4] ss:$12 sps:$4 sm:$0xff]   ;;  %v3621_v39 = vld [vmem:[#allocation4 + $0x2d0] ss:$12 sps:$4 sm:$0xff]   ;;  %v3626_v42 = vld [vmem:[#allocation4 + $0x138] ss:$12 sps:$4 sm:$0xff]  }
  0x4c   :  { %2058 = vmatpush1.bf16.msra.mxu0 %v3584_v14  ;;  %v3622_v40 = vld [vmem:[#allocation4 + $0x13c] ss:$12 sps:$4 sm:$0xff]   ;;  %v3627_v43 = vld [vmem:[#allocation4 + $0x2b8] ss:$12 sps:$4 sm:$0xff]   ;;  %v83_v46 = vld [vmem:[#allocation2] sm:$0xff]  ;;  %vm4110_vm0 = vmmov 0  }
  0x4d   :  { %2099 = vmatpush1.bf16.msra.mxu1 %v3585_v15  ;;  %2059 = vmatprep.subr.bf16.mxu0 %v3586_v16  ;;  %v3624_v41 = vld [vmem:[#allocation4 + $0x2bc] ss:$12 sps:$4 sm:$0xff]   ;;  %v3628_v44 = vld [vmem:[#allocation4 + $0x124] ss:$12 sps:$4 sm:$0xff]   ;;  %v4157_v47 = vcombine.high %v83_v46, %v83_v46  ;;  %v3632_v49 = vld [vmem:[#allocation4 + $0x120] ss:$12 sps:$4 sm:$0xff]   ;;  %v4163_v6 = vcombine.low %v83_v46, %v83_v46 }
  0x4e   :  { %2100 = vmatprep.subr.bf16.mxu1 %v3588_v17  ;;  %v3630_v45 = vld [vmem:[#allocation4 + $0x2a4] ss:$12 sps:$4 sm:$0xff]   ;;  %v84_v48 = vld [vmem:[#allocation2 + $0x8] sm:$0xff]  ;;  %v3633_v50 = vld [vmem:[#allocation4 + $0x2a0] ss:$12 sps:$4 sm:$0xff]   ;;  %vm3031_vm1 = vcmask 7168  }
  0x4f   :  { %v4159_v51 = vcombine.high %v84_v48, %v84_v48  ;;  %v3634_v52 = vld [vmem:[#allocation4 + $0x10c] ss:$12 sps:$4 sm:$0xff]   ;;  %2083 = vmatprep.mubr.bf16.mxu0 %v4157_v47  ;;  %v3638_v54 = vld [vmem:[#allocation4 + $0x108] ss:$12 sps:$4 sm:$0xff]   ;;  %v3644_v58 = vld [vmem:[#allocation4 + $0xf0] ss:$12 sps:$4 sm:$0xff]   ;;  %v4165_v7 = vcombine.low %v84_v48, %v84_v48 }
  0x50   :  { %2060 = vmatpush1.bf16.msra.mxu0 %v3590_v18  ;;  %v3636_v53 = vld [vmem:[#allocation4 + $0x28c] ss:$12 sps:$4 sm:$0xff]   ;;  %v3639_v55 = vld [vmem:[#allocation4 + $0x288] ss:$12 sps:$4 sm:$0xff]   ;;  %v3645_v59 = vld [vmem:[#allocation4 + $0x270] ss:$12 sps:$4 sm:$0xff]  }
  0x51   :  { %2101 = vmatpush1.bf16.msra.mxu1 %v3591_v19  ;;  %2061 = vmatprep.subr.bf16.mxu0 %v3592_v20  ;;  %v3640_v56 = vld [vmem:[#allocation4 + $0xf4] ss:$12 sps:$4 sm:$0xff]   ;;  %v3646_v60 = vld [vmem:[#allocation4 + $0xdc] ss:$12 sps:$4 sm:$0xff]   ;;  %v3650_v62 = vld [vmem:[#allocation4 + $0xd8] ss:$12 sps:$4 sm:$0xff]  }
  0x52   :  { %2102 = vmatprep.subr.bf16.mxu1 %v3594_v21  ;;  %2124 = vmatprep.mubr.bf16.mxu1 %v4159_v51  ;;  %v3642_v57 = vld [vmem:[#allocation4 + $0x274] ss:$12 sps:$4 sm:$0xff]   ;;  %v3648_v61 = vld [vmem:[#allocation4 + $0x25c] ss:$12 sps:$4 sm:$0xff]   ;;  %v3651_v63 = vld [vmem:[#allocation4 + $0x258] ss:$12 sps:$4 sm:$0xff]  }
  0x53   :  { %v3652_v0 = vld [vmem:[#allocation4 + $0xc4] ss:$12 sps:$4 sm:$0xff]   ;;  %v3656_v2 = vld [vmem:[#allocation4 + $0xc0] ss:$12 sps:$4 sm:$0xff]   ;;  %v3662_v8 = vld [vmem:[#allocation4 + $0x3a8] ss:$12 sps:$4 sm:$0xff]  }
  0x54   :  { %2062 = vmatpush1.bf16.msra.mxu0 %v3596_v22  ;;  %v3654_v1 = vld [vmem:[#allocation4 + $0x244] ss:$12 sps:$4 sm:$0xff]   ;;  %v3657_v3 = vld [vmem:[#allocation4 + $0x240] ss:$12 sps:$4 sm:$0xff]   ;;  %v3665_v9 = vld [vmem:[#allocation4 + $0x528] ss:$12 sps:$4 sm:$0xff]  }
  0x55   :  { %2103 = vmatpush1.bf16.msra.mxu1 %v3597_v23  ;;  %2063 = vmatprep.subr.bf16.mxu0 %v3598_v24  ;;  %v3664_v4 = vld [vmem:[#allocation4 + $0x3ac] ss:$12 sps:$4 sm:$0xff]   ;;  %v3670_v10 = vld [vmem:[#allocation4 + $0x394] ss:$12 sps:$4 sm:$0xff]   ;;  %v3668_v12 = vld [vmem:[#allocation4 + $0x390] ss:$12 sps:$4 sm:$0xff]  }
  0x56   :  { %2104 = vmatprep.subr.bf16.mxu1 %v3600_v25  ;;  %v3667_v5 = vld [vmem:[#allocation4 + $0x52c] ss:$12 sps:$4 sm:$0xff]   ;;  %v3673_v11 = vld [vmem:[#allocation4 + $0x514] ss:$12 sps:$4 sm:$0xff]   ;;  %v3671_v13 = vld [vmem:[#allocation4 + $0x510] ss:$12 sps:$4 sm:$0xff]  }
  0x57   :  { %v3676_v14 = vld [vmem:[#allocation4 + $0x37c] ss:$12 sps:$4 sm:$0xff]   ;;  %v3674_v16 = vld [vmem:[#allocation4 + $0x378] ss:$12 sps:$4 sm:$0xff]   ;;  %v3680_v20 = vld [vmem:[#allocation4 + $0x360] ss:$12 sps:$4 sm:$0xff]  }
  0x58   :  { %2064 = vmatpush1.bf16.msra.mxu0 %v3602_v26  ;;  %v3679_v15 = vld [vmem:[#allocation4 + $0x4fc] ss:$12 sps:$4 sm:$0xff]   ;;  %v3677_v17 = vld [vmem:[#allocation4 + $0x4f8] ss:$12 sps:$4 sm:$0xff]   ;;  %v3683_v21 = vld [vmem:[#allocation4 + $0x4e0] ss:$12 sps:$4 sm:$0xff]  }
  0x59   :  { %2105 = vmatpush1.bf16.msra.mxu1 %v3603_v27  ;;  %2065 = vmatprep.subr.bf16.mxu0 %v3604_v28  ;;  %v3682_v18 = vld [vmem:[#allocation4 + $0x364] ss:$12 sps:$4 sm:$0xff]   ;;  %v3688_v22 = vld [vmem:[#allocation4 + $0x34c] ss:$12 sps:$4 sm:$0xff]   ;;  %v3686_v24 = vld [vmem:[#allocation4 + $0x348] ss:$12 sps:$4 sm:$0xff]  }
  0x5a   :  { %2106 = vmatprep.subr.bf16.mxu1 %v3606_v29  ;;  %v3685_v19 = vld [vmem:[#allocation4 + $0x4e4] ss:$12 sps:$4 sm:$0xff]   ;;  %v3691_v23 = vld [vmem:[#allocation4 + $0x4cc] ss:$12 sps:$4 sm:$0xff]   ;;  %v3689_v25 = vld [vmem:[#allocation4 + $0x4c8] ss:$12 sps:$4 sm:$0xff]  }
  0x5b   :  { %v3694_v26 = vld [vmem:[#allocation4 + $0x334] ss:$12 sps:$4 sm:$0xff]   ;;  %v3692_v28 = vld [vmem:[#allocation4 + $0x330] ss:$12 sps:$4 sm:$0xff]  }
  0x5c   :  { %2066 = vmatpush1.bf16.msra.mxu0 %v3608_v30  ;;  %v3697_v27 = vld [vmem:[#allocation4 + $0x4b4] ss:$12 sps:$4 sm:$0xff]   ;;  %v3695_v29 = vld [vmem:[#allocation4 + $0x4b0] ss:$12 sps:$4 sm:$0xff]  }
  0x5d   :  { %2107 = vmatpush1.bf16.msra.mxu1 %v3609_v31  ;;  %2067 = vmatprep.subr.bf16.mxu0 %v3610_v32  ;;  %v3700_v30 = vld [vmem:[#allocation4 + $0x31c] ss:$12 sps:$4 sm:$0xff]   ;;  %v4169_v32 = vld [vmem:[#allocation2 + $0x10] sm:$0xff] }
  0x5e   :  { %2108 = vmatprep.subr.bf16.mxu1 %v3612_v33  ;;  %v3703_v31 = vld [vmem:[#allocation4 + $0x49c] ss:$12 sps:$4 sm:$0xff]   ;;  %v3718_v46 = vld [vmem:[#allocation4 + $0x454] ss:$12 sps:$4 sm:$0xff]  }
  0x5f   :  { %v4171_v33 = vld [vmem:[#allocation2 + $0x18] sm:$0xff]  ;;  %v3721_v48 = vld [vmem:[#allocation4 + $0x5d4] ss:$12 sps:$4 sm:$0xff]  }
  0x60   :  { %2068 = vmatpush2.bf16.msra.mxu0 %v3614_v34  ;;  %v3698_v34 = vld [vmem:[#allocation4 + $0x318] ss:$12 sps:$4 sm:$0xff]  }
  0x61   :  { %2109 = vmatpush2.bf16.msra.mxu1 %v3615_v35  ;;  %2069 = vmatprep.subr.bf16.mxu0 %v3616_v36  ;;  %v3701_v35 = vld [vmem:[#allocation4 + $0x498] ss:$12 sps:$4 sm:$0xff]   ;;  %v4175_v36 = vcombine.high %v4169_v32, %v4169_v32 }
  0x62   :  { %2110 = vmatprep.subr.bf16.mxu1 %v3618_v37  ;;  %v4179_v37 = vcombine.high %v4171_v33, %v4171_v33 }
  0x64   :  { %2070 = vmatpush2.bf16.msra.mxu0 %v3620_v38  ;;  %v3706_v38 = vld [vmem:[#allocation4 + $0x304] ss:$12 sps:$4 sm:$0xff]  }
  0x65   :  { %2111 = vmatpush2.bf16.msra.mxu1 %v3621_v39  ;;  %2071 = vmatprep.subr.bf16.mxu0 %v3622_v40  ;;  %v3709_v39 = vld [vmem:[#allocation4 + $0x484] ss:$12 sps:$4 sm:$0xff]   ;;  %v3704_v40 = vld [vmem:[#allocation4 + $0x300] ss:$12 sps:$4 sm:$0xff]  }
  0x66   :  { %2112 = vmatprep.subr.bf16.mxu1 %v3624_v41  ;;  %v3707_v41 = vld [vmem:[#allocation4 + $0x480] ss:$12 sps:$4 sm:$0xff]  }
  0x68   :  { %2072 = vmatpush2.bf16.msra.mxu0 %v3626_v42  ;;  %v3712_v42 = vld [vmem:[#allocation4 + $0x46c] ss:$12 sps:$4 sm:$0xff]  }
  0x69   :  { %2113 = vmatpush2.bf16.msra.mxu1 %v3627_v43  ;;  %2073 = vmatprep.subr.bf16.mxu0 %v3628_v44  ;;  %v3715_v43 = vld [vmem:[#allocation4 + $0x5ec] ss:$12 sps:$4 sm:$0xff]   ;;  %v3710_v44 = vld [vmem:[#allocation4 + $0x468] ss:$12 sps:$4 sm:$0xff]  }
  0x6a   :  { %2114 = vmatprep.subr.bf16.mxu1 %v3630_v45  ;;  %v3713_v45 = vld [vmem:[#allocation4 + $0x5e8] ss:$12 sps:$4 sm:$0xff]  }
  0x6c   :  { %2074 = vmatpush2.bf16.msra.mxu0 %v3632_v49  ;;  %v3716_v49 = vld [vmem:[#allocation4 + $0x450] ss:$12 sps:$4 sm:$0xff]  }
  0x6d   :  { %2115 = vmatpush2.bf16.msra.mxu1 %v3633_v50  ;;  %2075 = vmatprep.subr.bf16.mxu0 %v3634_v52  ;;  %v3719_v50 = vld [vmem:[#allocation4 + $0x5d0] ss:$12 sps:$4 sm:$0xff]  }
  0x6e   :  { %2116 = vmatprep.subr.bf16.mxu1 %v3636_v53  ;;  %v3724_v52 = vld [vmem:[#allocation4 + $0x43c] ss:$12 sps:$4 sm:$0xff]  }
  0x6f   :  { %v3727_v53 = vld [vmem:[#allocation4 + $0x5bc] ss:$12 sps:$4 sm:$0xff]  }
  0x70   :  { %2076 = vmatpush2.bf16.msra.mxu0 %v3638_v54  ;;  %v3722_v54 = vld [vmem:[#allocation4 + $0x438] ss:$12 sps:$4 sm:$0xff]  }
  0x71   :  { %2117 = vmatpush2.bf16.msra.mxu1 %v3639_v55  ;;  %2077 = vmatprep.subr.bf16.mxu0 %v3640_v56  ;;  %v3725_v55 = vld [vmem:[#allocation4 + $0x5b8] ss:$12 sps:$4 sm:$0xff]  }
  0x72   :  { %2118 = vmatprep.subr.bf16.mxu1 %v3642_v57  ;;  %v3730_v56 = vld [vmem:[#allocation4 + $0x424] ss:$12 sps:$4 sm:$0xff]  }
  0x73   :  { %v3733_v57 = vld [vmem:[#allocation4 + $0x5a4] ss:$12 sps:$4 sm:$0xff]  }
  0x74   :  { %2078 = vmatpush2.bf16.msra.mxu0 %v3644_v58  ;;  %v3728_v58 = vld [vmem:[#allocation4 + $0x420] ss:$12 sps:$4 sm:$0xff]  }
  0x75   :  { %2119 = vmatpush2.bf16.msra.mxu1 %v3645_v59  ;;  %2079 = vmatprep.subr.bf16.mxu0 %v3646_v60  ;;  %v3731_v59 = vld [vmem:[#allocation4 + $0x5a0] ss:$12 sps:$4 sm:$0xff]  }
  0x76   :  { %2120 = vmatprep.subr.bf16.mxu1 %v3648_v61  ;;  %v3736_v60 = vld [vmem:[#allocation4 + $0x40c] ss:$12 sps:$4 sm:$0xff]  }
  0x77   :  { %v3739_v61 = vld [vmem:[#allocation4 + $0x58c] ss:$12 sps:$4 sm:$0xff]  }
  0x78   :  { %2080 = vmatpush2.bf16.msra.mxu0 %v3650_v62  ;;  %v3734_v62 = vld [vmem:[#allocation4 + $0x408] ss:$12 sps:$4 sm:$0xff]  }
  0x79   :  { %2121 = vmatpush2.bf16.msra.mxu1 %v3651_v63  ;;  %2081 = vmatprep.subr.bf16.mxu0 %v3652_v0  ;;  %v3737_v63 = vld [vmem:[#allocation4 + $0x588] ss:$12 sps:$4 sm:$0xff]  }
  0x7a   :  { %2122 = vmatprep.subr.bf16.mxu1 %v3654_v1  ;;  %v3742_v0 = vld [vmem:[#allocation4 + $0x3f4] ss:$12 sps:$4 sm:$0xff]  }
  0x7b   :  { %v3745_v1 = vld [vmem:[#allocation4 + $0x574] ss:$12 sps:$4 sm:$0xff]  }
  0x7c   :  { %2082 = vmatpush2.bf16.msra.mxu0 %v3656_v2  ;;  %v3740_v2 = vld [vmem:[#allocation4 + $0x3f0] ss:$12 sps:$4 sm:$0xff]  }
  0x7d   :  { %2123 = vmatpush2.bf16.msra.mxu1 %v3657_v3  ;;  %2133 = vmatprep.subr.bf16.mxu0 %v3664_v4  ;;  %v3743_v3 = vld [vmem:[#allocation4 + $0x570] ss:$12 sps:$4 sm:$0xff]  }
  0x7e   :  { %2174 = vmatprep.subr.bf16.mxu1 %v3667_v5  ;;  %v3748_v4 = vld [vmem:[#allocation4 + $0x3dc] ss:$12 sps:$4 sm:$0xff]  }
  0x7f   :  { %2084 = vmatmul.mubr.bf16.vlgmr.msra.gmra.mxu0 %v4163_v6  ;;  %v3751_v5 = vld [vmem:[#allocation4 + $0x55c] ss:$12 sps:$4 sm:$0xff]  }
  0x80   :  { %2125 = vmatmul.mubr.bf16.vlgmr.msra.gmra.mxu1 %v4165_v7  ;;  %2134 = vmatpush1.bf16.msra.mxu0 %v3662_v8  ;;  %v3746_v8 = vld [vmem:[#allocation4 + $0x3d8] ss:$12 sps:$4 sm:$0xff]  }
  0x81   :  { %2175 = vmatpush1.bf16.msra.mxu1 %v3665_v9  ;;  %2135 = vmatprep.subr.bf16.mxu0 %v3670_v10  ;;  %v3749_v9 = vld [vmem:[#allocation4 + $0x558] ss:$12 sps:$4 sm:$0xff]  }
  0x82   :  { %2176 = vmatprep.subr.bf16.mxu1 %v3673_v11  ;;  %2165 = vmatprep.mubr.bf16.mxu0 %v4175_v36  ;;  %v3754_v10 = vld [vmem:[#allocation4 + $0x3c4] ss:$12 sps:$4 sm:$0xff]  }
  0x83   :  { %2206 = vmatprep.mubr.bf16.mxu1 %v4179_v37  ;;  %v3757_v11 = vld [vmem:[#allocation4 + $0x544] ss:$12 sps:$4 sm:$0xff]  }
  0x84   :  { %2136 = vmatpush1.bf16.msra.mxu0 %v3668_v12  ;;  %v3752_v12 = vld [vmem:[#allocation4 + $0x3c0] ss:$12 sps:$4 sm:$0xff]  }
  0x85   :  { %2177 = vmatpush1.bf16.msra.mxu1 %v3671_v13  ;;  %2137 = vmatprep.subr.bf16.mxu0 %v3676_v14  ;;  %v3755_v13 = vld [vmem:[#allocation4 + $0x540] ss:$12 sps:$4 sm:$0xff]  }
  0x86   :  { %2178 = vmatprep.subr.bf16.mxu1 %v3679_v15  ;;  %v3764_v14 = vld [vmem:[#allocation4 + $0x6ac] ss:$12 sps:$4 sm:$0xff]  }
  0x87   :  { %v3767_v15 = vld [vmem:[#allocation4 + $0x82c] ss:$12 sps:$4 sm:$0xff]  }
  0x88   :  { %2138 = vmatpush1.bf16.msra.mxu0 %v3674_v16  ;;  %v4185_v16 = vcombine.low %v4169_v32, %v4169_v32  ;;  %v3782_v32 = vld [vmem:[#allocation4 + $0x664] ss:$12 sps:$4 sm:$0xff]  }
  0x89   :  { %2179 = vmatpush1.bf16.msra.mxu1 %v3677_v17  ;;  %2139 = vmatprep.subr.bf16.mxu0 %v3682_v18  ;;  %v4189_v17 = vcombine.low %v4171_v33, %v4171_v33  ;;  %v3762_v18 = vld [vmem:[#allocation4 + $0x6a8] ss:$12 sps:$4 sm:$0xff]   ;;  %v3785_v33 = vld [vmem:[#allocation4 + $0x7e4] ss:$12 sps:$4 sm:$0xff]  }
  0x8a   :  { %2180 = vmatprep.subr.bf16.mxu1 %v3685_v19  ;;  %v3765_v19 = vld [vmem:[#allocation4 + $0x828] ss:$12 sps:$4 sm:$0xff]  }
  0x8c   :  { %2140 = vmatpush1.bf16.msra.mxu0 %v3680_v20  ;;  %v3770_v20 = vld [vmem:[#allocation4 + $0x694] ss:$12 sps:$4 sm:$0xff]  }
  0x8d   :  { %2181 = vmatpush1.bf16.msra.mxu1 %v3683_v21  ;;  %2141 = vmatprep.subr.bf16.mxu0 %v3688_v22  ;;  %v3773_v21 = vld [vmem:[#allocation4 + $0x814] ss:$12 sps:$4 sm:$0xff]  }
  0x8e   :  { %2182 = vmatprep.subr.bf16.mxu1 %v3691_v23  ;;  %v4191_v22 = vld [vmem:[#allocation2 + $0x20] sm:$0xff]  ;;  %v4193_v23 = vld [vmem:[#allocation2 + $0x28] sm:$0xff] }
  0x90   :  { %2142 = vmatpush1.bf16.msra.mxu0 %v3686_v24  ;;  %v3768_v24 = vld [vmem:[#allocation4 + $0x690] ss:$12 sps:$4 sm:$0xff]  }
  0x91   :  { %2183 = vmatpush1.bf16.msra.mxu1 %v3689_v25  ;;  %2143 = vmatprep.subr.bf16.mxu0 %v3694_v26  ;;  %v4197_v25 = vcombine.high %v4191_v22, %v4191_v22  ;;  %v4201_v26 = vcombine.high %v4193_v23, %v4193_v23 }
  0x92   :  { %2184 = vmatprep.subr.bf16.mxu1 %v3697_v27  ;;  %v3771_v27 = vld [vmem:[#allocation4 + $0x810] ss:$12 sps:$4 sm:$0xff]  }
  0x94   :  { %2144 = vmatpush1.bf16.msra.mxu0 %v3692_v28  ;;  %v3776_v28 = vld [vmem:[#allocation4 + $0x67c] ss:$12 sps:$4 sm:$0xff]  }
  0x95   :  { %2185 = vmatpush1.bf16.msra.mxu1 %v3695_v29  ;;  %2145 = vmatprep.subr.bf16.mxu0 %v3700_v30  ;;  %v3779_v29 = vld [vmem:[#allocation4 + $0x7fc] ss:$12 sps:$4 sm:$0xff]   ;;  %v3774_v30 = vld [vmem:[#allocation4 + $0x678] ss:$12 sps:$4 sm:$0xff]  }
  0x96   :  { %2186 = vmatprep.subr.bf16.mxu1 %v3703_v31  ;;  %v3777_v31 = vld [vmem:[#allocation4 + $0x7f8] ss:$12 sps:$4 sm:$0xff]  }
  0x98   :  { %2146 = vmatpush1.bf16.msra.mxu0 %v3698_v34  ;;  %v3780_v34 = vld [vmem:[#allocation4 + $0x660] ss:$12 sps:$4 sm:$0xff]  }
  0x99   :  { %2187 = vmatpush1.bf16.msra.mxu1 %v3701_v35  ;;  %2147 = vmatprep.subr.bf16.mxu0 %v3706_v38  ;;  %v3783_v35 = vld [vmem:[#allocation4 + $0x7e0] ss:$12 sps:$4 sm:$0xff]  }
  0x9a   :  { %2188 = vmatprep.subr.bf16.mxu1 %v3709_v39  ;;  %v3788_v38 = vld [vmem:[#allocation4 + $0x64c] ss:$12 sps:$4 sm:$0xff]  }
  0x9b   :  { %v3791_v39 = vld [vmem:[#allocation4 + $0x7cc] ss:$12 sps:$4 sm:$0xff]  }
  0x9c   :  { %2148 = vmatpush1.bf16.msra.mxu0 %v3704_v40  ;;  %v3786_v40 = vld [vmem:[#allocation4 + $0x648] ss:$12 sps:$4 sm:$0xff]  }
  0x9d   :  { %2189 = vmatpush1.bf16.msra.mxu1 %v3707_v41  ;;  %2149 = vmatprep.subr.bf16.mxu0 %v3712_v42  ;;  %v3789_v41 = vld [vmem:[#allocation4 + $0x7c8] ss:$12 sps:$4 sm:$0xff]  }
  0x9e   :  { %2190 = vmatprep.subr.bf16.mxu1 %v3715_v43  ;;  %v3794_v42 = vld [vmem:[#allocation4 + $0x634] ss:$12 sps:$4 sm:$0xff]  }
  0x9f   :  { %v3797_v43 = vld [vmem:[#allocation4 + $0x7b4] ss:$12 sps:$4 sm:$0xff]  }
  0xa0   :  { %2150 = vmatpush2.bf16.msra.mxu0 %v3710_v44  ;;  %v3792_v44 = vld [vmem:[#allocation4 + $0x630] ss:$12 sps:$4 sm:$0xff]  }
  0xa1   :  { %2191 = vmatpush2.bf16.msra.mxu1 %v3713_v45  ;;  %2151 = vmatprep.subr.bf16.mxu0 %v3718_v46  ;;  %v3795_v45 = vld [vmem:[#allocation4 + $0x7b0] ss:$12 sps:$4 sm:$0xff]  }
  0xa2   :  { %2192 = vmatprep.subr.bf16.mxu1 %v3721_v48  ;;  %v3800_v46 = vld [vmem:[#allocation4 + $0x61c] ss:$12 sps:$4 sm:$0xff]  }
  0xa3   :  { %v3803_v48 = vld [vmem:[#allocation4 + $0x79c] ss:$12 sps:$4 sm:$0xff]  }
  0xa4   :  { %2152 = vmatpush2.bf16.msra.mxu0 %v3716_v49  ;;  %v3798_v49 = vld [vmem:[#allocation4 + $0x618] ss:$12 sps:$4 sm:$0xff]  }
  0xa5   :  { %2193 = vmatpush2.bf16.msra.mxu1 %v3719_v50  ;;  %2153 = vmatprep.subr.bf16.mxu0 %v3724_v52  ;;  %v3801_v50 = vld [vmem:[#allocation4 + $0x798] ss:$12 sps:$4 sm:$0xff]  }
  0xa6   :  { %2194 = vmatprep.subr.bf16.mxu1 %v3727_v53  ;;  %v3806_v52 = vld [vmem:[#allocation4 + $0x604] ss:$12 sps:$4 sm:$0xff]  }
  0xa7   :  { %v3809_v53 = vld [vmem:[#allocation4 + $0x784] ss:$12 sps:$4 sm:$0xff]  }
  0xa8   :  { %2154 = vmatpush2.bf16.msra.mxu0 %v3722_v54  ;;  %v3804_v54 = vld [vmem:[#allocation4 + $0x600] ss:$12 sps:$4 sm:$0xff]  }
  0xa9   :  { %2195 = vmatpush2.bf16.msra.mxu1 %v3725_v55  ;;  %2155 = vmatprep.subr.bf16.mxu0 %v3730_v56  ;;  %v3807_v55 = vld [vmem:[#allocation4 + $0x780] ss:$12 sps:$4 sm:$0xff]  }
  0xaa   :  { %2196 = vmatprep.subr.bf16.mxu1 %v3733_v57  ;;  %v3812_v56 = vld [vmem:[#allocation4 + $0x76c] ss:$12 sps:$4 sm:$0xff]  }
  0xab   :  { %v3815_v57 = vld [vmem:[#allocation4 + $0x8ec] ss:$12 sps:$4 sm:$0xff]  }
  0xac   :  { %2156 = vmatpush2.bf16.msra.mxu0 %v3728_v58  ;;  %v3810_v58 = vld [vmem:[#allocation4 + $0x768] ss:$12 sps:$4 sm:$0xff]  }
  0xad   :  { %2197 = vmatpush2.bf16.msra.mxu1 %v3731_v59  ;;  %2157 = vmatprep.subr.bf16.mxu0 %v3736_v60  ;;  %v3813_v59 = vld [vmem:[#allocation4 + $0x8e8] ss:$12 sps:$4 sm:$0xff]  }
  0xae   :  { %2198 = vmatprep.subr.bf16.mxu1 %v3739_v61  ;;  %v3818_v60 = vld [vmem:[#allocation4 + $0x754] ss:$12 sps:$4 sm:$0xff]  }
  0xaf   :  { %v3821_v61 = vld [vmem:[#allocation4 + $0x8d4] ss:$12 sps:$4 sm:$0xff]  }
  0xb0   :  { %2158 = vmatpush2.bf16.msra.mxu0 %v3734_v62  ;;  %v3816_v62 = vld [vmem:[#allocation4 + $0x750] ss:$12 sps:$4 sm:$0xff]  }
  0xb1   :  { %2199 = vmatpush2.bf16.msra.mxu1 %v3737_v63  ;;  %2159 = vmatprep.subr.bf16.mxu0 %v3742_v0  ;;  %v3819_v63 = vld [vmem:[#allocation4 + $0x8d0] ss:$12 sps:$4 sm:$0xff]  }
  0xb2   :  { %2200 = vmatprep.subr.bf16.mxu1 %v3745_v1  ;;  %v3824_v0 = vld [vmem:[#allocation4 + $0x73c] ss:$12 sps:$4 sm:$0xff]  }
  0xb3   :  { %v3827_v1 = vld [vmem:[#allocation4 + $0x8bc] ss:$12 sps:$4 sm:$0xff]  }
  0xb4   :  { %2160 = vmatpush2.bf16.msra.mxu0 %v3740_v2  ;;  %v3822_v2 = vld [vmem:[#allocation4 + $0x738] ss:$12 sps:$4 sm:$0xff]  }
  0xb5   :  { %2201 = vmatpush2.bf16.msra.mxu1 %v3743_v3  ;;  %2161 = vmatprep.subr.bf16.mxu0 %v3748_v4  ;;  %v3825_v3 = vld [vmem:[#allocation4 + $0x8b8] ss:$12 sps:$4 sm:$0xff]  }
  0xb6   :  { %2202 = vmatprep.subr.bf16.mxu1 %v3751_v5  ;;  %v3830_v4 = vld [vmem:[#allocation4 + $0x724] ss:$12 sps:$4 sm:$0xff]  }
  0xb7   :  { %v3833_v5 = vld [vmem:[#allocation4 + $0x8a4] ss:$12 sps:$4 sm:$0xff]  }
  0xb8   :  { %2162 = vmatpush2.bf16.msra.mxu0 %v3746_v8  ;;  %v3828_v8 = vld [vmem:[#allocation4 + $0x720] ss:$12 sps:$4 sm:$0xff]  }
  0xb9   :  { %2203 = vmatpush2.bf16.msra.mxu1 %v3749_v9  ;;  %2163 = vmatprep.subr.bf16.mxu0 %v3754_v10  ;;  %v3831_v9 = vld [vmem:[#allocation4 + $0x8a0] ss:$12 sps:$4 sm:$0xff]  }
  0xba   :  { %2204 = vmatprep.subr.bf16.mxu1 %v3757_v11  ;;  %v3836_v10 = vld [vmem:[#allocation4 + $0x70c] ss:$12 sps:$4 sm:$0xff]  }
  0xbb   :  { %v3839_v11 = vld [vmem:[#allocation4 + $0x88c] ss:$12 sps:$4 sm:$0xff]  }
  0xbc   :  { %2164 = vmatpush2.bf16.msra.mxu0 %v3752_v12  ;;  %v3834_v12 = vld [vmem:[#allocation4 + $0x708] ss:$12 sps:$4 sm:$0xff]  }
  0xbd   :  { %2205 = vmatpush2.bf16.msra.mxu1 %v3755_v13  ;;  %2215 = vmatprep.subr.bf16.mxu0 %v3764_v14  ;;  %v3837_v13 = vld [vmem:[#allocation4 + $0x888] ss:$12 sps:$4 sm:$0xff]  }
  0xbe   :  { %2256 = vmatprep.subr.bf16.mxu1 %v3767_v15  ;;  %v3842_v14 = vld [vmem:[#allocation4 + $0x6f4] ss:$12 sps:$4 sm:$0xff]  }
  0xbf   :  { %2166 = vmatmul.mubr.bf16.vlgmr.msra.gmra.mxu0 %v4185_v16  ;;  %v3845_v15 = vld [vmem:[#allocation4 + $0x874] ss:$12 sps:$4 sm:$0xff]  }
  0xc0   :  { %2207 = vmatmul.mubr.bf16.vlgmr.msra.gmra.mxu1 %v4189_v17  ;;  %2216 = vmatpush1.bf16.msra.mxu0 %v3762_v18  ;;  %v3840_v18 = vld [vmem:[#allocation4 + $0x6f0] ss:$12 sps:$4 sm:$0xff]  }
  0xc1   :  { %2257 = vmatpush1.bf16.msra.mxu1 %v3765_v19  ;;  %2217 = vmatprep.subr.bf16.mxu0 %v3770_v20  ;;  %v3843_v19 = vld [vmem:[#allocation4 + $0x870] ss:$12 sps:$4 sm:$0xff]  }
  0xc2   :  { %2258 = vmatprep.subr.bf16.mxu1 %v3773_v21  ;;  %2247 = vmatprep.mubr.bf16.mxu0 %v4197_v25  ;;  %v3848_v20 = vld [vmem:[#allocation4 + $0x6dc] ss:$12 sps:$4 sm:$0xff]  }
  0xc3   :  { %2288 = vmatprep.mubr.bf16.mxu1 %v4201_v26  ;;  %v3851_v21 = vld [vmem:[#allocation4 + $0x85c] ss:$12 sps:$4 sm:$0xff]  }
  0xc4   :  { %2218 = vmatpush1.bf16.msra.mxu0 %v3768_v24  ;;  %v3846_v24 = vld [vmem:[#allocation4 + $0x6d8] ss:$12 sps:$4 sm:$0xff]  }
  0xc5   :  { %2259 = vmatpush1.bf16.msra.mxu1 %v3771_v27  ;;  %2219 = vmatprep.subr.bf16.mxu0 %v3776_v28  ;;  %v3849_v27 = vld [vmem:[#allocation4 + $0x858] ss:$12 sps:$4 sm:$0xff]  }
  0xc6   :  { %2260 = vmatprep.subr.bf16.mxu1 %v3779_v29  ;;  %v3854_v28 = vld [vmem:[#allocation4 + $0x6c4] ss:$12 sps:$4 sm:$0xff]  }
  0xc7   :  { %v3857_v29 = vld [vmem:[#allocation4 + $0x844] ss:$12 sps:$4 sm:$0xff]  }
  0xc8   :  { %2220 = vmatpush1.bf16.msra.mxu0 %v3774_v30  ;;  %v3852_v30 = vld [vmem:[#allocation4 + $0x6c0] ss:$12 sps:$4 sm:$0xff]  }
  0xc9   :  { %2261 = vmatpush1.bf16.msra.mxu1 %v3777_v31  ;;  %2221 = vmatprep.subr.bf16.mxu0 %v3782_v32  ;;  %v3855_v31 = vld [vmem:[#allocation4 + $0x840] ss:$12 sps:$4 sm:$0xff]   ;;  %v3862_v32 = vld [vmem:[#allocation4 + $0x170] ss:$12 sps:$4 sm:$0xff]  }
  0xca   :  { %2262 = vmatprep.subr.bf16.mxu1 %v3785_v33  ;;  %v3863_v33 = vld [vmem:[#allocation4 + $0x2f0] ss:$12 sps:$4 sm:$0xff]  }
  0xcc   :  { %2222 = vmatpush1.bf16.msra.mxu0 %v3780_v34  ;;  %v3864_v34 = vld [vmem:[#allocation4 + $0xb0] ss:$12 sps:$4 sm:$0xff]  }
  0xcd   :  { %2263 = vmatpush1.bf16.msra.mxu1 %v3783_v35  ;;  %2223 = vmatprep.subr.bf16.mxu0 %v3788_v38  ;;  %v4209_v35 = vcombine.low %v4191_v22, %v4191_v22  ;;  %v4213_v38 = vcombine.low %v4193_v23, %v4193_v23  ;;  %v3870_v22 = vld [vmem:[#allocation4 + $0x140] ss:$12 sps:$4 sm:$0xff]  }
  0xce   :  { %2264 = vmatprep.subr.bf16.mxu1 %v3791_v39  ;;  %v3865_v39 = vld [vmem:[#allocation4 + $0x230] ss:$12 sps:$4 sm:$0xff]   ;;  %v3871_v23 = vld [vmem:[#allocation4 + $0x2c0] ss:$12 sps:$4 sm:$0xff]  }
  0xd0   :  { %2224 = vmatpush1.bf16.msra.mxu0 %v3786_v40  ;;  %v3866_v40 = vld [vmem:[#allocation4 + $0x158] ss:$12 sps:$4 sm:$0xff]  }
  0xd1   :  { %2265 = vmatpush1.bf16.msra.mxu1 %v3789_v41  ;;  %2225 = vmatprep.subr.bf16.mxu0 %v3794_v42  ;;  %v3867_v41 = vld [vmem:[#allocation4 + $0x2d8] ss:$12 sps:$4 sm:$0xff]  }
  0xd2   :  { %2266 = vmatprep.subr.bf16.mxu1 %v3797_v43  ;;  %v3868_v42 = vld [vmem:[#allocation4 + $0x98] ss:$12 sps:$4 sm:$0xff]  }
  0xd3   :  { %v3869_v43 = vld [vmem:[#allocation4 + $0x218] ss:$12 sps:$4 sm:$0xff]  }
  0xd4   :  { %2226 = vmatpush1.bf16.msra.mxu0 %v3792_v44  ;;  %v3872_v44 = vld [vmem:[#allocation4 + $0x80] ss:$12 sps:$4 sm:$0xff]  }
  0xd5   :  { %2267 = vmatpush1.bf16.msra.mxu1 %v3795_v45  ;;  %2227 = vmatprep.subr.bf16.mxu0 %v3800_v46  ;;  %v3873_v45 = vld [vmem:[#allocation4 + $0x200] ss:$12 sps:$4 sm:$0xff]   ;;  %v3874_v46 = vld [vmem:[#allocation4 + $0x128] ss:$12 sps:$4 sm:$0xff]  }
  0xd6   :  { %2268 = vmatprep.subr.bf16.mxu1 %v3803_v48  ;;  %v3875_v48 = vld [vmem:[#allocation4 + $0x2a8] ss:$12 sps:$4 sm:$0xff]  }
  0xd8   :  { %2228 = vmatpush1.bf16.msra.mxu0 %v3798_v49  ;;  %v3876_v49 = vld [vmem:[#allocation4 + $0x68] ss:$12 sps:$4 sm:$0xff]  }
  0xd9   :  { %2269 = vmatpush1.bf16.msra.mxu1 %v3801_v50  ;;  %2229 = vmatprep.subr.bf16.mxu0 %v3806_v52  ;;  %v3877_v50 = vld [vmem:[#allocation4 + $0x1e8] ss:$12 sps:$4 sm:$0xff]   ;;  %v3878_v52 = vld [vmem:[#allocation4 + $0x110] ss:$12 sps:$4 sm:$0xff]  }
  0xda   :  { %2270 = vmatprep.subr.bf16.mxu1 %v3809_v53  ;;  %v3879_v53 = vld [vmem:[#allocation4 + $0x290] ss:$12 sps:$4 sm:$0xff]  }
  0xdc   :  { %2230 = vmatpush1.bf16.msra.mxu0 %v3804_v54  ;;  %v3880_v54 = vld [vmem:[#allocation4 + $0x50] ss:$12 sps:$4 sm:$0xff]  }
  0xdd   :  { %2271 = vmatpush1.bf16.msra.mxu1 %v3807_v55  ;;  %2231 = vmatprep.subr.bf16.mxu0 %v3812_v56  ;;  %v3881_v55 = vld [vmem:[#allocation4 + $0x1d0] ss:$12 sps:$4 sm:$0xff]   ;;  %v3884_v56 = vld [vmem:[#allocation4 + $0x38] ss:$12 sps:$4 sm:$0xff]  }
  0xde   :  { %2272 = vmatprep.subr.bf16.mxu1 %v3815_v57  ;;  %v3885_v57 = vld [vmem:[#allocation4 + $0x1b8] ss:$12 sps:$4 sm:$0xff]  }
  0xe0   :  { %2232 = vmatpush2.bf16.msra.mxu0 %v3810_v58  ;;  %v3886_v58 = vld [vmem:[#allocation4 + $0xe0] ss:$12 sps:$4 sm:$0xff]  }
  0xe1   :  { %2273 = vmatpush2.bf16.msra.mxu1 %v3813_v59  ;;  %2233 = vmatprep.subr.bf16.mxu0 %v3818_v60  ;;  %v3887_v59 = vld [vmem:[#allocation4 + $0x260] ss:$12 sps:$4 sm:$0xff]  }
  0xe2   :  { %2274 = vmatprep.subr.bf16.mxu1 %v3821_v61  ;;  %v3888_v60 = vld [vmem:[#allocation4 + $0x20] ss:$12 sps:$4 sm:$0xff]  }
  0xe3   :  { %v3889_v61 = vld [vmem:[#allocation4 + $0x1a0] ss:$12 sps:$4 sm:$0xff]  }
  0xe4   :  { %2234 = vmatpush2.bf16.msra.mxu0 %v3816_v62  ;;  %v3890_v62 = vld [vmem:[#allocation4 + $0xc8] ss:$12 sps:$4 sm:$0xff]  }
  0xe5   :  { %2275 = vmatpush2.bf16.msra.mxu1 %v3819_v63  ;;  %2235 = vmatprep.subr.bf16.mxu0 %v3824_v0  ;;  %v3891_v63 = vld [vmem:[#allocation4 + $0x248] ss:$12 sps:$4 sm:$0xff]  }
  0xe6   :  { %2276 = vmatprep.subr.bf16.mxu1 %v3827_v1  ;;  %v3892_v0 = vld [vmem:[#allocation4 + $0x8] ss:$12 sps:$4 sm:$0xff]  }
  0xe7   :  { %v3893_v1 = vld [vmem:[#allocation4 + $0x188] ss:$12 sps:$4 sm:$0xff]  }
  0xe8   :  { %2236 = vmatpush2.bf16.msra.mxu0 %v3822_v2  ;;  %v3894_v2 = vld [vmem:[#allocation4 + $0x470] ss:$12 sps:$4 sm:$0xff]  }
  0xe9   :  { %2277 = vmatpush2.bf16.msra.mxu1 %v3825_v3  ;;  %2237 = vmatprep.subr.bf16.mxu0 %v3830_v4  ;;  %v3895_v3 = vld [vmem:[#allocation4 + $0x5f0] ss:$12 sps:$4 sm:$0xff]  }
  0xea   :  { %2278 = vmatprep.subr.bf16.mxu1 %v3833_v5  ;;  %v3896_v4 = vld [vmem:[#allocation4 + $0x3b0] ss:$12 sps:$4 sm:$0xff]  }
  0xeb   :  { %v3897_v5 = vld [vmem:[#allocation4 + $0x530] ss:$12 sps:$4 sm:$0xff]  }
  0xec   :  { %2238 = vmatpush2.bf16.msra.mxu0 %v3828_v8  ;;  %v3898_v8 = vld [vmem:[#allocation4 + $0x458] ss:$12 sps:$4 sm:$0xff]  }
  0xed   :  { %2279 = vmatpush2.bf16.msra.mxu1 %v3831_v9  ;;  %2239 = vmatprep.subr.bf16.mxu0 %v3836_v10  ;;  %v3899_v9 = vld [vmem:[#allocation4 + $0x5d8] ss:$12 sps:$4 sm:$0xff]  }
  0xee   :  { %2280 = vmatprep.subr.bf16.mxu1 %v3839_v11  ;;  %v3900_v10 = vld [vmem:[#allocation4 + $0x398] ss:$12 sps:$4 sm:$0xff]  }
  0xef   :  { %v3901_v11 = vld [vmem:[#allocation4 + $0x518] ss:$12 sps:$4 sm:$0xff]  }
  0xf0   :  { %2240 = vmatpush2.bf16.msra.mxu0 %v3834_v12  ;;  %v3902_v12 = vld [vmem:[#allocation4 + $0x440] ss:$12 sps:$4 sm:$0xff]  }
  0xf1   :  { %2281 = vmatpush2.bf16.msra.mxu1 %v3837_v13  ;;  %2241 = vmatprep.subr.bf16.mxu0 %v3842_v14  ;;  %v3903_v13 = vld [vmem:[#allocation4 + $0x5c0] ss:$12 sps:$4 sm:$0xff]  }
  0xf2   :  { %2282 = vmatprep.subr.bf16.mxu1 %v3845_v15  ;;  %v3904_v14 = vld [vmem:[#allocation4 + $0x380] ss:$12 sps:$4 sm:$0xff]  }
  0xf3   :  { %v3905_v15 = vld [vmem:[#allocation4 + $0x500] ss:$12 sps:$4 sm:$0xff]  }
  0xf4   :  { %2242 = vmatpush2.bf16.msra.mxu0 %v3840_v18  ;;  %v3906_v18 = vld [vmem:[#allocation4 + $0x428] ss:$12 sps:$4 sm:$0xff]  }
  0xf5   :  { %2283 = vmatpush2.bf16.msra.mxu1 %v3843_v19  ;;  %2243 = vmatprep.subr.bf16.mxu0 %v3848_v20  ;;  %v3907_v19 = vld [vmem:[#allocation4 + $0x5a8] ss:$12 sps:$4 sm:$0xff]   ;;  %v3910_v20 = vld [vmem:[#allocation4 + $0x410] ss:$12 sps:$4 sm:$0xff]  }
  0xf6   :  { %2284 = vmatprep.subr.bf16.mxu1 %v3851_v21  ;;  %v3911_v21 = vld [vmem:[#allocation4 + $0x590] ss:$12 sps:$4 sm:$0xff]  }
  0xf8   :  { %2244 = vmatpush2.bf16.msra.mxu0 %v3846_v24  ;;  %v3912_v24 = vld [vmem:[#allocation4 + $0x350] ss:$12 sps:$4 sm:$0xff]  }
  0xf9   :  { %2285 = vmatpush2.bf16.msra.mxu1 %v3849_v27  ;;  %2245 = vmatprep.subr.bf16.mxu0 %v3854_v28  ;;  %v3913_v27 = vld [vmem:[#allocation4 + $0x4d0] ss:$12 sps:$4 sm:$0xff]   ;;  %v3914_v28 = vld [vmem:[#allocation4 + $0x3f8] ss:$12 sps:$4 sm:$0xff]  }
  0xfa   :  { %2286 = vmatprep.subr.bf16.mxu1 %v3857_v29  ;;  %v3917_v29 = vld [vmem:[#allocation4 + $0x4b8] ss:$12 sps:$4 sm:$0xff]  }
  0xfc   :  { %2246 = vmatpush2.bf16.msra.mxu0 %v3852_v30  ;;  %v3918_v30 = vld [vmem:[#allocation4 + $0x3e0] ss:$12 sps:$4 sm:$0xff]  }
  0xfd   :  { %2287 = vmatpush2.bf16.msra.mxu1 %v3855_v31  ;;  %3367 = vmatprep.subr.bf16.mxu0 %v3862_v32  ;;  %v3919_v31 = vld [vmem:[#allocation4 + $0x560] ss:$12 sps:$4 sm:$0xff]  }
  0xfe   :  { %3389 = vmatprep.subr.bf16.mxu1 %v3863_v33  ;;  %v3920_v32 = vld [vmem:[#allocation4 + $0x320] ss:$12 sps:$4 sm:$0xff]  }
  0xff   :  { %2248 = vmatmul.mubr.bf16.vlgmr.msra.gmra.mxu0 %v4209_v35  ;;  %v3921_v33 = vld [vmem:[#allocation4 + $0x4a0] ss:$12 sps:$4 sm:$0xff]  }
 0x100   :  { %2289 = vmatmul.mubr.bf16.vlgmr.msra.gmra.mxu1 %v4213_v38  ;;  %3368 = vmatpush3.bf16.msra.mxu0 %v3864_v34  ;;  %v3922_v34 = vld [vmem:[#allocation4 + $0x3c8] ss:$12 sps:$4 sm:$0xff]  }
 0x101   :  { %3390 = vmatpush3.bf16.msra.mxu1 %v3865_v39  ;;  %3369 = vmatprep.subr.bf16.mxu0 %v3866_v40  ;;  %v3923_v39 = vld [vmem:[#allocation4 + $0x548] ss:$12 sps:$4 sm:$0xff]  }
 0x102   :  { %3391 = vmatprep.subr.bf16.mxu1 %v3867_v41  ;;  %2329 = vmatprep.mubr.bf16.mxu0 %v4157_v47  ;;  %v3882_v47 = vld [vmem:[#allocation4 + $0xf8] ss:$12 sps:$4 sm:$0xff]   ;;  %v3924_v40 = vld [vmem:[#allocation4 + $0x308] ss:$12 sps:$4 sm:$0xff]  }
 0x103   :  { %2369 = vmatprep.mubr.bf16.mxu1 %v4159_v51  ;;  %v3883_v51 = vld [vmem:[#allocation4 + $0x278] ss:$12 sps:$4 sm:$0xff]   ;;  %v3925_v41 = vld [vmem:[#allocation4 + $0x488] ss:$12 sps:$4 sm:$0xff]  }
 0x104   :  { %3370 = vmatpush3.bf16.msra.mxu0 %v3868_v42  ;;  %v3926_v42 = vld [vmem:[#allocation4 + $0x770] ss:$12 sps:$4 sm:$0xff]  }
 0x105   :  { %3392 = vmatpush3.bf16.msra.mxu1 %v3869_v43  ;;  %3371 = vmatprep.subr.bf16.mxu0 %v3870_v22  ;;  %v3927_v43 = vld [vmem:[#allocation4 + $0x8f0] ss:$12 sps:$4 sm:$0xff]  }
 0x106   :  { %3393 = vmatprep.subr.bf16.mxu1 %v3871_v23  ;;  %v3928_v22 = vld [vmem:[#allocation4 + $0x6b0] ss:$12 sps:$4 sm:$0xff]  }
 0x107   :  { %v3929_v23 = vld [vmem:[#allocation4 + $0x830] ss:$12 sps:$4 sm:$0xff]  }
 0x108   :  { %3372 = vmatpush3.bf16.msra.mxu0 %v3872_v44  ;;  %v3930_v44 = vld [vmem:[#allocation4 + $0x758] ss:$12 sps:$4 sm:$0xff]  }
 0x109   :  { %3394 = vmatpush3.bf16.msra.mxu1 %v3873_v45  ;;  %3373 = vmatprep.subr.bf16.mxu0 %v3874_v46  ;;  %v3931_v45 = vld [vmem:[#allocation4 + $0x8d8] ss:$12 sps:$4 sm:$0xff]  }
 0x10a   :  { %3395 = vmatprep.subr.bf16.mxu1 %v3875_v48 }
 0x10c   :  { %3374 = vmatpush3.bf16.msra.mxu0 %v3876_v49 }
 0x10d   :  { %3396 = vmatpush3.bf16.msra.mxu1 %v3877_v50  ;;  %3375 = vmatprep.subr.bf16.mxu0 %v3878_v52  ;;  %v3932_v50 = vld [vmem:[#allocation4 + $0x698] ss:$12 sps:$4 sm:$0xff]  }
 0x10e   :  { %3397 = vmatprep.subr.bf16.mxu1 %v3879_v53  ;;  %v3933_v52 = vld [vmem:[#allocation4 + $0x818] ss:$12 sps:$4 sm:$0xff]  }
 0x110   :  { %3376 = vmatpush3.bf16.msra.mxu0 %v3880_v54 }
 0x111   :  { %3398 = vmatpush3.bf16.msra.mxu1 %v3881_v55  ;;  %3377 = vmatprep.subr.bf16.mxu0 %v3882_v47  ;;  %v3934_v55 = vld [vmem:[#allocation4 + $0x740] ss:$12 sps:$4 sm:$0xff]  }
 0x112   :  { %3399 = vmatprep.subr.bf16.mxu1 %v3883_v51  ;;  %v3935_v47 = vld [vmem:[#allocation4 + $0x8c0] ss:$12 sps:$4 sm:$0xff]  }
 0x114   :  { %3378 = vmatpush3.bf16.msra.mxu0 %v3884_v56  ;;  %v3936_v56 = vld [vmem:[#allocation4 + $0x680] ss:$12 sps:$4 sm:$0xff]  }
 0x115   :  { %3400 = vmatpush3.bf16.msra.mxu1 %v3885_v57  ;;  %3379 = vmatprep.subr.bf16.mxu0 %v3886_v58  ;;  %v3937_v57 = vld [vmem:[#allocation4 + $0x800] ss:$12 sps:$4 sm:$0xff]  }
 0x116   :  { %3401 = vmatprep.subr.bf16.mxu1 %v3887_v59 }
 0x118   :  { %3380 = vmatpush3.bf16.msra.mxu0 %v3888_v60  ;;  %v3938_v60 = vld [vmem:[#allocation4 + $0x728] ss:$12 sps:$4 sm:$0xff]  }
 0x119   :  { %3402 = vmatpush3.bf16.msra.mxu1 %v3889_v61  ;;  %3381 = vmatprep.subr.bf16.mxu0 %v3890_v62  ;;  %v3939_v61 = vld [vmem:[#allocation4 + $0x8a8] ss:$12 sps:$4 sm:$0xff]  }
 0x11a   :  { %3403 = vmatprep.subr.bf16.mxu1 %v3891_v63  ;;  %v3940_v62 = vld [vmem:[#allocation4 + $0x668] ss:$12 sps:$4 sm:$0xff]  }
 0x11b   :  { %v3941_v63 = vld [vmem:[#allocation4 + $0x7e8] ss:$12 sps:$4 sm:$0xff]  }
 0x11c   :  { %3382 = vmatpush3.bf16.msra.mxu0 %v3892_v0  ;;  %v3944_v0 = vld [vmem:[#allocation4 + $0x650] ss:$12 sps:$4 sm:$0xff]  }
 0x11d   :  { %3404 = vmatpush3.bf16.msra.mxu1 %v3893_v1  ;;  %3411 = vmatprep.subr.bf16.mxu0 %v3894_v2  ;;  %v3945_v1 = vld [vmem:[#allocation4 + $0x7d0] ss:$12 sps:$4 sm:$0xff]   ;;  %v3946_v2 = vld [vmem:[#allocation4 + $0x6f8] ss:$12 sps:$4 sm:$0xff]  }
 0x11e   :  { %3433 = vmatprep.subr.bf16.mxu1 %v3895_v3  ;;  %v3947_v3 = vld [vmem:[#allocation4 + $0x878] ss:$12 sps:$4 sm:$0xff]  }
 0x11f   :  { %2330 = vmatmul.mubr.bf16.vlgmr.msra.gmra.mxu0 %v4163_v6  ;;  %v3908_v6 = vld [vmem:[#allocation4 + $0x368] ss:$12 sps:$4 sm:$0xff]  }
 0x120   :  { %2370 = vmatmul.mubr.bf16.vlgmr.msra.gmra.mxu1 %v4165_v7  ;;  %3412 = vmatpush3.bf16.msra.mxu0 %v3896_v4  ;;  %v3909_v7 = vld [vmem:[#allocation4 + $0x4e8] ss:$12 sps:$4 sm:$0xff]   ;;  %v3948_v4 = vld [vmem:[#allocation4 + $0x638] ss:$12 sps:$4 sm:$0xff]  }
 0x121   :  { %3434 = vmatpush3.bf16.msra.mxu1 %v3897_v5  ;;  %3413 = vmatprep.subr.bf16.mxu0 %v3898_v8  ;;  %v3949_v5 = vld [vmem:[#allocation4 + $0x7b8] ss:$12 sps:$4 sm:$0xff]   ;;  %v3950_v8 = vld [vmem:[#allocation4 + $0x6e0] ss:$12 sps:$4 sm:$0xff]  }
 0x122   :  { %3435 = vmatprep.subr.bf16.mxu1 %v3899_v9  ;;  %2409 = vmatprep.mubr.bf16.mxu0 %v4175_v36  ;;  %v3915_v36 = vld [vmem:[#allocation4 + $0x578] ss:$12 sps:$4 sm:$0xff]   ;;  %v3951_v9 = vld [vmem:[#allocation4 + $0x860] ss:$12 sps:$4 sm:$0xff]  }
 0x123   :  { %2449 = vmatprep.mubr.bf16.mxu1 %v4179_v37  ;;  %v3916_v37 = vld [vmem:[#allocation4 + $0x338] ss:$12 sps:$4 sm:$0xff]  }
 0x124   :  { %3414 = vmatpush3.bf16.msra.mxu0 %v3900_v10  ;;  %v3952_v10 = vld [vmem:[#allocation4 + $0x620] ss:$12 sps:$4 sm:$0xff]  }
 0x125   :  { %3436 = vmatpush3.bf16.msra.mxu1 %v3901_v11  ;;  %3415 = vmatprep.subr.bf16.mxu0 %v3902_v12  ;;  %v3953_v11 = vld [vmem:[#allocation4 + $0x7a0] ss:$12 sps:$4 sm:$0xff]   ;;  %v3954_v12 = vld [vmem:[#allocation4 + $0x6c8] ss:$12 sps:$4 sm:$0xff]  }
 0x126   :  { %3437 = vmatprep.subr.bf16.mxu1 %v3903_v13  ;;  %v3955_v13 = vld [vmem:[#allocation4 + $0x848] ss:$12 sps:$4 sm:$0xff]  }
 0x128   :  { %3416 = vmatpush3.bf16.msra.mxu0 %v3904_v14  ;;  %v3956_v14 = vld [vmem:[#allocation4 + $0x608] ss:$12 sps:$4 sm:$0xff]  }
 0x129   :  { %3438 = vmatpush3.bf16.msra.mxu1 %v3905_v15  ;;  %3417 = vmatprep.subr.bf16.mxu0 %v3906_v18  ;;  %v3957_v15 = vld [vmem:[#allocation4 + $0x788] ss:$12 sps:$4 sm:$0xff]  }
 0x12a   :  { %3439 = vmatprep.subr.bf16.mxu1 %v3907_v19 }
 0x12c   :  { %3418 = vmatpush3.bf16.msra.mxu0 %v3908_v6 }
 0x12d   :  { %3440 = vmatpush3.bf16.msra.mxu1 %v3909_v7  ;;  %3419 = vmatprep.subr.bf16.mxu0 %v3910_v20 }
 0x12e   :  { %3441 = vmatprep.subr.bf16.mxu1 %v3911_v21 }
 0x130   :  { %3420 = vmatpush3.bf16.msra.mxu0 %v3912_v24 }
 0x131   :  { %3442 = vmatpush3.bf16.msra.mxu1 %v3913_v27  ;;  %3421 = vmatprep.subr.bf16.mxu0 %v3914_v28 }
 0x132   :  { %3443 = vmatprep.subr.bf16.mxu1 %v3915_v36 }
 0x134   :  { %3422 = vmatpush3.bf16.msra.mxu0 %v3916_v37 }
 0x135   :  { %3444 = vmatpush3.bf16.msra.mxu1 %v3917_v29  ;;  %3423 = vmatprep.subr.bf16.mxu0 %v3918_v30  ;;  %v3958_v30 = vld [vmem:[#allocation6 + $0x78] sm:$0xff]  }
 0x136   :  { %3445 = vmatprep.subr.bf16.mxu1 %v3919_v31  ;;  %v3959_v31 = vld [vmem:[#allocation6 + $0xb8] sm:$0xff]  }
 0x138   :  { %3424 = vmatpush3.bf16.msra.mxu0 %v3920_v32  ;;  %v3960_v32 = vld [vmem:[#allocation6 + $0x38] sm:$0xff]  }
 0x139   :  { %3446 = vmatpush3.bf16.msra.mxu1 %v3921_v33  ;;  %3425 = vmatprep.subr.bf16.mxu0 %v3922_v34  ;;  %v3961_v34 = vld [vmem:[#allocation6 + $0x70] sm:$0xff]  }
 0x13a   :  { %3447 = vmatprep.subr.bf16.mxu1 %v3923_v39 }
 0x13c   :  { %3426 = vmatpush3.bf16.msra.mxu0 %v3924_v40  ;;  %v3962_v40 = vld [vmem:[#allocation6 + $0xb0] sm:$0xff]  }
 0x13d   :  { %3448 = vmatpush3.bf16.msra.mxu1 %v3925_v41  ;;  %3455 = vmatprep.subr.bf16.mxu0 %v3926_v42 }
 0x13e   :  { %3477 = vmatprep.subr.bf16.mxu1 %v3927_v43  ;;  %v3963_v43 = vld [vmem:[#allocation6 + $0x30] sm:$0xff]  }
 0x13f   :  { %v2085_v46 = vpop.f32.mrf.mxu0  ;;  %2410 = vmatmul.mubr.bf16.vlgmr.msra.gmra.mxu0 %v4185_v16 }
 0x140   :  { %v2126_v48 = vpop.f32.mrf.mxu1  ;;  %2450 = vmatmul.mubr.bf16.vlgmr.msra.gmra.mxu1 %v4189_v17  ;;  %3456 = vmatpush3.bf16.msra.mxu0 %v3928_v22 }
 0x141   :  { %v4225_v49 = vadd.f32 %v2126_v48, %v2085_v46  ;;  %3478 = vmatpush3.bf16.msra.mxu1 %v3929_v23  ;;  %v2087_v53 = vpop.f32.mrf.mxu0  ;;  %3457 = vmatprep.subr.bf16.mxu0 %v3930_v44  ;;  %v3964_v44 = vld [vmem:[#allocation6 + $0x68] sm:$0xff]  }
 0x142   :  { %v2128_v54 = vpop.f32.mrf.mxu1  ;;  %3479 = vmatprep.subr.bf16.mxu1 %v3931_v45  ;;  %2489 = vmatprep.mubr.bf16.mxu0 %v4197_v25  ;;  %v3942_v25 = vld [vmem:[#allocation4 + $0x710] ss:$12 sps:$4 sm:$0xff]  }
 0x143   :  { %v4227_v51 = vadd.f32 %v2128_v54, %v2087_v53  ;;  %2529 = vmatprep.mubr.bf16.mxu1 %v4201_v26  ;;  %v2089_v16 = vpop.f32.mrf.mxu0  ;;  %v3943_v26 = vld [vmem:[#allocation4 + $0x890] ss:$12 sps:$4 sm:$0xff]  }
 0x144   :  { %v2130_v17 = vpop.f32.mrf.mxu1  ;;  %3458 = vmatpush3.bf16.msra.mxu0 %v3932_v50 }
 0x145   :  { %3480 = vmatpush3.bf16.msra.mxu1 %v3933_v52  ;;  %v2090_v58 = vpop.f32.mrf.mxu0  ;;  %3459 = vmatprep.subr.bf16.mxu0 %v3934_v55  ;;  %v3965_v52 = vld [vmem:[#allocation6 + $0xa8] sm:$0xff]  }
 0x146   :  { %v2131_v59 = vpop.f32.mrf.mxu1  ;;  %3481 = vmatprep.subr.bf16.mxu1 %v3935_v47  ;;  %v3966_v55 = vld [vmem:[#allocation6 + $0x28] sm:$0xff]  }
 0x148   :  { %3460 = vmatpush3.bf16.msra.mxu0 %v3936_v56  ;;  %v3967_v56 = vld [vmem:[#allocation6 + $0x60] sm:$0xff]  }
 0x149   :  { %3482 = vmatpush3.bf16.msra.mxu1 %v3937_v57  ;;  %3461 = vmatprep.subr.bf16.mxu0 %v3938_v60 }
 0x14a   :  { %3483 = vmatprep.subr.bf16.mxu1 %v3939_v61  ;;  %v3968_v61 = vld [vmem:[#allocation6 + $0xa0] sm:$0xff]  }
 0x14c   :  { %3462 = vmatpush3.bf16.msra.mxu0 %v3940_v62  ;;  %v3969_v62 = vld [vmem:[#allocation6 + $0x20] sm:$0xff]  }
 0x14d   :  { %3484 = vmatpush3.bf16.msra.mxu1 %v3941_v63  ;;  %3463 = vmatprep.subr.bf16.mxu0 %v3942_v25 }
 0x14e   :  { %3485 = vmatprep.subr.bf16.mxu1 %v3943_v26 }
 0x150   :  { %3464 = vmatpush3.bf16.msra.mxu0 %v3944_v0 }
 0x151   :  { %3486 = vmatpush3.bf16.msra.mxu1 %v3945_v1  ;;  %3465 = vmatprep.subr.bf16.mxu0 %v3946_v2  ;;  %v3970_v1 = vld [vmem:[#allocation6 + $0x58] sm:$0xff]  }
 0x152   :  { %3487 = vmatprep.subr.bf16.mxu1 %v3947_v3 }
 0x154   :  { %3466 = vmatpush3.bf16.msra.mxu0 %v3948_v4 }
 0x155   :  { %3488 = vmatpush3.bf16.msra.mxu1 %v3949_v5  ;;  %3467 = vmatprep.subr.bf16.mxu0 %v3950_v8  ;;  %v3971_v8 = vld [vmem:[#allocation6 + $0x98] sm:$0xff]  }
 0x156   :  { %3489 = vmatprep.subr.bf16.mxu1 %v3951_v9  ;;  %v3972_v9 = vld [vmem:[#allocation6 + $0x18] sm:$0xff]  }
 0x158   :  { %3468 = vmatpush3.bf16.msra.mxu0 %v3952_v10 }
 0x159   :  { %3490 = vmatpush3.bf16.msra.mxu1 %v3953_v11  ;;  %3469 = vmatprep.subr.bf16.mxu0 %v3954_v12 }
 0x15a   :  { %3491 = vmatprep.subr.bf16.mxu1 %v3955_v13 }
 0x15c   :  { %3470 = vmatpush3.bf16.msra.mxu0 %v3956_v14  ;;  %v3973_v14 = vld [vmem:[#allocation6 + $0x50] sm:$0xff]  }
 0x15d   :  { %3492 = vmatpush3.bf16.msra.mxu1 %v3957_v15  ;;  %3499 = vmatprep.subr.bf16.mxu0 %v3958_v30  ;;  %v3977_v30 = vld [vmem:[#allocation6 + $0x88] sm:$0xff]  }
 0x15f   :  { %2490 = vmatmul.mubr.bf16.vlgmr.msra.gmra.mxu0 %v4209_v35 }
 0x160   :  { %2530 = vmatmul.mubr.bf16.vlgmr.msra.gmra.mxu1 %v4213_v38  ;;  %v4109_v38 = vmov 0.0   ;;  %3500 = vmatpush3.bf16.msra.mxu0 %v3960_v32  ;;  %v3978_v32 = vld [vmem:[#allocation6 + $0x8] sm:$0xff]  }
 0x161   :  { %3530 = vmatprep.subr.bf16.mxu1 %v4109_v38  ;;  %3546 = vmatprep.mubr.msk.bf16.mxu1 %vm4110_vm0, %v4109_v38 }
 0x162   :  { %3531 = vmatpush3.bf16.msra.mxu1 %v3959_v31  ;;  %3501 = vmatprep.subr.bf16.mxu0 %v3961_v34 }
 0x163   :  { %3532 = vmatprep.subr.bf16.mxu1 %v4109_v38 }
 0x164   :  { %3502 = vmatpush3.bf16.msra.mxu0 %v3963_v43 }
 0x165   :  { %3503 = vmatprep.subr.bf16.mxu0 %v3964_v44 }
 0x166   :  { %3533 = vmatpush3.bf16.msra.mxu1 %v3962_v40  ;;  %v3980_v40 = vld [vmem:[#allocation6 + $0x80] sm:$0xff]  }
 0x167   :  { %3534 = vmatprep.subr.bf16.mxu1 %v4109_v38 }
 0x168   :  { %3504 = vmatpush3.bf16.msra.mxu0 %v3966_v55 }
 0x169   :  { %3505 = vmatprep.subr.bf16.mxu0 %v3967_v56 }
 0x16a   :  { %3535 = vmatpush3.bf16.msra.mxu1 %v3965_v52 }
 0x16b   :  { %3536 = vmatprep.subr.bf16.mxu1 %v4109_v38 }
 0x16c   :  { %3506 = vmatpush3.bf16.msra.mxu0 %v3969_v62 }
 0x16d   :  { %3507 = vmatprep.subr.bf16.mxu0 %v3970_v1 }
 0x16e   :  { %3537 = vmatpush3.bf16.msra.mxu1 %v3968_v61 }
 0x16f   :  { %3538 = vmatprep.subr.bf16.mxu1 %v4109_v38 }
 0x170   :  { %3508 = vmatpush3.bf16.msra.mxu0 %v3972_v9 }
 0x171   :  { %3509 = vmatprep.subr.bf16.mxu0 %v3973_v14 }
 0x172   :  { %3539 = vmatpush3.bf16.msra.mxu1 %v3971_v8 }
 0x173   :  { %3540 = vmatprep.subr.bf16.mxu1 %v4109_v38 }
 0x17f   :  { %v2167_v18 = vpop.f32.mrf.mxu0 }
 0x180   :  { %v2208_v19 = vpop.f32.mrf.mxu1  ;;  %v2168_v6 = vadd.f32 %v2167_v18, %v4225_v49 }
 0x181   :  { %v2169_v7 = vpop.f32.mrf.mxu0 }
 0x182   :  { %v2210_v20 = vpop.f32.mrf.mxu1  ;;  %v2209_v21 = vadd.f32 %v2208_v19, %v2168_v6  ;;  %v2170_v24 = vadd.f32 %v2169_v7, %v4227_v51  ;;  %v3974_v7 = vld [vmem:[#allocation6 + $0x90] sm:$0xff]  }
 0x183   :  { %v2171_v27 = vpop.f32.mrf.mxu0  ;;  %3541 = vmatpush3.bf16.msra.mxu1 %v3974_v7 }
 0x184   :  { %v2212_v28 = vpop.f32.mrf.mxu1  ;;  %v2211_v36 = vadd.f32 %v2210_v20, %v2170_v24  ;;  %v3975_v20 = vld [vmem:[#allocation6 + $0x10] sm:$0xff]   ;;  %3542 = vmatprep.subr.bf16.mxu1 %v4109_v38 }
 0x185   :  { %v2172_v37 = vpop.f32.mrf.mxu0  ;;  %v3976_v28 = vld [vmem:[#allocation6 + $0x48] sm:$0xff]   ;;  %3510 = vmatpush3.bf16.msra.mxu0 %v3975_v20 }
 0x186   :  { %v2213_v29 = vpop.f32.mrf.mxu1  ;;  %3511 = vmatprep.subr.bf16.mxu0 %v3976_v28 }
 0x187   :  { %3543 = vmatpush3.bf16.msra.mxu1 %v3977_v30 }
 0x188   :  { %3544 = vmatprep.subr.bf16.mxu1 %v4109_v38 }
 0x189   :  { %3512 = vmatpush3.bf16.msra.mxu0 %v3978_v32 }
 0x18b   :  { %3545 = vmatpush3.bf16.msra.mxu1 %v3980_v40 }
 0x1bf   :  { %v2249_v35 = vpop.f32.mrf.mxu0 }
 0x1c0   :  { %v2290_v33 = vpop.f32.mrf.mxu1  ;;  %v2250_v39 = vadd.f32 %v2249_v35, %v2209_v21 }
 0x1c1   :  { %v2251_v41 = vpop.f32.mrf.mxu0 }
 0x1c2   :  { %v2292_v42 = vpop.f32.mrf.mxu1  ;;  %v4238_v22 = vadd.f32 %v2290_v33, %v2250_v39  ;;  %v2252_v23 = vadd.f32 %v2251_v41, %v2211_v36  ;;  %v3979_v33 = vld [vmem:[#allocation6 + $0x40] sm:$0xff]  }
 0x1c3   :  { %v2253_v45 = vpop.f32.mrf.mxu0  ;;  %3513 = vmatprep.subr.bf16.mxu0 %v3979_v33 }
 0x1c4   :  { %v2294_v46 = vpop.f32.mrf.mxu1  ;;  %v2540_v48 = vrot.slane %v4238_v22, 4  ;;  %v2558_v49 = vmul.f32 %v4238_v22, %v4238_v22  ;;  %v4243_v50 = vadd.f32 %v2292_v42, %v2252_v23  ;;  %v3981_v42 = vld [vmem:[#allocation6] sm:$0xff]  }
 0x1c5   :  { %v2254_v53 = vpop.f32.mrf.mxu0  ;;  %3514 = vmatpush3.bf16.msra.mxu0 %v3981_v42 }
 0x1c6   :  { %v2295_v54 = vpop.f32.mrf.mxu1  ;;  %v2541_v47 = vadd.f32 %v2540_v48, %v4238_v22  ;;  %v2561_v51 = vrot.slane %v2558_v49, 4  ;;  %v2546_v16 = vrot.slane %v4243_v50, 4  ;;  %v2559_v17 = vmul.f32 %v4243_v50, %v4243_v50 }
 0x1c8   :  { %v2542_v57 = vrot.slane %v2541_v47, 2  ;;  %v2562_v58 = vadd.f32 %v2561_v51, %v2558_v49  ;;  %v2547_v59 = vadd.f32 %v2546_v16, %v4243_v50  ;;  %v2567_v60 = vrot.slane %v2559_v17, 4 }
 0x1ca   :  { %v2543_v63 = vadd.f32 %v2542_v57, %v2541_v47  ;;  %v2563_v25 = vrot.slane %v2562_v58, 2  ;;  %v2548_v26 = vrot.slane %v2547_v59, 2  ;;  %v2568_v0 = vadd.f32 %v2567_v60, %v2559_v17 }
 0x1cc   :  { %v2544_v2 = vrot.slane %v2543_v63, 1  ;;  %v2564_v3 = vadd.f32 %v2563_v25, %v2562_v58  ;;  %v2549_v4 = vadd.f32 %v2548_v26, %v2547_v59  ;;  %v2569_v5 = vrot.slane %v2568_v0, 2 }
 0x1ce   :  { %v2545_v10 = vadd.f32 %v2544_v2, %v2543_v63  ;;  %v2565_v11 = vrot.slane %v2564_v3, 1  ;;  %v2550_v12 = vrot.slane %v2549_v4, 1  ;;  %v2570_v13 = vadd.f32 %v2569_v5, %v2568_v0 }
 0x1d0   :  { %v2566_v15 = vadd.f32 %v2565_v11, %v2564_v3  ;;  %v4253_v18 = vmul.f32 0.125, %v2545_v10  ;;  %v2551_v19 = vadd.f32 %v2550_v12, %v2549_v4  ;;  %v2571_v6 = vrot.slane %v2570_v13, 1 }
 0x1d2   :  { %v2582_v21 = vmul.f32 0.125, %v2566_v15  ;;  %v2585_v24 = vmul.f32 %v4253_v18, %v4253_v18  ;;  %v2572_v27 = vadd.f32 %v2571_v6, %v2570_v13  ;;  %v4258_v36 = vmul.f32 0.125, %v2551_v19 }
 0x1d4   :  { %v2588_v37 = vsub.f32 %v2582_v21, %v2585_v24  ;;  %v2583_v29 = vmul.f32 0.125, %v2572_v27  ;;  %v2586_v31 = vmul.f32 %v4258_v36, %v4258_v36 }
 0x1d6   :  { %v2591_v35 = vmax.f32 %v2588_v37, 0.0  ;;  %v2589_v34 = vsub.f32 %v2583_v29, %v2586_v31 }
 0x1d8   :  { %v2594_v39 = vadd.f32 1e-05, %v2591_v35  ;;  %v2592_v41 = vmax.f32 %v2589_v34, 0.0 }
 0x1da   :  { %v2595_v43 = vadd.f32 1e-05, %v2592_v41  ;;  %3982 = vrsqrt.f32 %v2594_v39  ;;  %v4111_v41 = vmov 1966171168  }
 0x1db   :  { %v2605_v42 = vunpack.c.l.s4 %v4111_v41 }
 0x1dc   :  { %3984 = vrsqrt.f32 %v2595_v43  ;;  %v2607_v43 = vlaneseq }
 0x1df   :  { %v3383_v23 = vpop.f32.mrf.mxu0 }
 0x1e0   :  { %v3405_v44 = vpop.f32.mrf.mxu1 }
 0x1e1   :  { %v3384_v45 = vpop.f32.mrf.mxu0 }
 0x1e2   :  { %v3406_v46 = vpop.f32.mrf.mxu1  ;;  %v3385_v60 = vadd.f32 %v3384_v45, %v3383_v23  ;;  %v2606_v23 = vunpack.c.0.s8 %v2605_v42 }
 0x1e3   :  { %v3386_v48 = vpop.f32.mrf.mxu0  ;;  %v3407_v61 = vadd.f32 %v3406_v46, %v3405_v44  ;;  %v2608_v44 = vshrl.u32 %v2607_v43, 7 }
 0x1e4   :  { %v3408_v49 = vpop.f32.mrf.mxu1 }
 0x1e5   :  { %v3387_v52 = vpop.f32.mrf.mxu0  ;;  %v2372_v63 = vadd.f32 %v3407_v61, %v3385_v60  ;;  %v2609_v45 = vsub.s32 %v2606_v23, %v2608_v44 }
 0x1e6   :  { %v3409_v53 = vpop.f32.mrf.mxu1 }
 0x1e7   :  { %v3983_v54 = vpop.eup %3982  ;;  %v2537_v53 = vld [vmem:[#allocation7] ss:$2 sm:$0x7] }
 0x1e9   :  { %v3985_v55 = vpop.eup %3984 }
 0x1ea   :  { %v2603_v47 = vcombine.low %v3983_v54, %v3985_v55  ;;  %v4264_v55 = vsub.s32 0, %v2608_v44 }
 0x1ec   :  { %v2610_v48 = vrot.slane %v2603_v47, %v2609_v45 }
 0x1ff   :  { %v3427_v51 = vpop.f32.mrf.mxu0 }
 0x200   :  { %v3449_v38 = vpop.f32.mrf.mxu1 }
 0x201   :  { %v3428_v16 = vpop.f32.mrf.mxu0 }
 0x202   :  { %v3450_v17 = vpop.f32.mrf.mxu1  ;;  %v3429_v62 = vadd.f32 %v3428_v16, %v3427_v51  ;;  %v2635_v51 = vsub.s32 1, %v2608_v44 }
 0x203   :  { %v3430_v56 = vpop.f32.mrf.mxu0  ;;  %v3451_v26 = vadd.f32 %v3450_v17, %v3449_v38  ;;  %v2639_v38 = vsub.s32 2, %v2608_v44 }
 0x204   :  { %v3452_v57 = vpop.f32.mrf.mxu1  ;;  %v2412_v25 = vadd.f32 %v3429_v62, %v2372_v63 }
 0x205   :  { %v3431_v58 = vpop.f32.mrf.mxu0 }
 0x206   :  { %v3453_v59 = vpop.f32.mrf.mxu1  ;;  %v2452_v4 = vadd.f32 %v3451_v26, %v2412_v25 }
 0x21f   :  { %v3471_v0 = vpop.f32.mrf.mxu0 }
 0x220   :  { %v3493_v1 = vpop.f32.mrf.mxu1 }
 0x221   :  { %v3472_v2 = vpop.f32.mrf.mxu0 }
 0x222   :  { %v3494_v3 = vpop.f32.mrf.mxu1  ;;  %v3473_v5 = vadd.f32 %v3472_v2, %v3471_v0  ;;  %v2539_v0 = vld [vmem:[#allocation7 + $0x1] ss:$2 sm:$0x7] }
 0x223   :  { %v3474_v8 = vpop.f32.mrf.mxu0  ;;  %v3495_v11 = vadd.f32 %v3494_v3, %v3493_v1 }
 0x224   :  { %v3496_v9 = vpop.f32.mrf.mxu1  ;;  %v2492_v10 = vadd.f32 %v3473_v5, %v2452_v4 }
 0x225   :  { %v3475_v12 = vpop.f32.mrf.mxu0 }
 0x226   :  { %v3497_v13 = vpop.f32.mrf.mxu1  ;;  %v2532_v14 = vadd.f32 %v3495_v11, %v2492_v10 }
 0x228   :  { %v2552_v15 = vrot.slane %v2532_v14, 4  ;;  %v2560_v19 = vmul.f32 %v2532_v14, %v2532_v14 }
 0x22a   :  { %v2553_v6 = vadd.f32 %v2552_v15, %v2532_v14  ;;  %v2573_v7 = vrot.slane %v2560_v19, 4 }
 0x22c   :  { %v2554_v20 = vrot.slane %v2553_v6, 2  ;;  %v2574_v21 = vadd.f32 %v2573_v7, %v2560_v19 }
 0x22e   :  { %v2555_v24 = vadd.f32 %v2554_v20, %v2553_v6  ;;  %v2575_v27 = vrot.slane %v2574_v21, 2 }
 0x230   :  { %v2556_v28 = vrot.slane %v2555_v24, 1  ;;  %v2576_v37 = vadd.f32 %v2575_v27, %v2574_v21 }
 0x232   :  { %v2557_v29 = vadd.f32 %v2556_v28, %v2555_v24  ;;  %v2577_v30 = vrot.slane %v2576_v37, 1 }
 0x234   :  { %v2578_v31 = vadd.f32 %v2577_v30, %v2576_v37  ;;  %v2581_v32 = vmul.f32 0.125, %v2557_v29 }
 0x236   :  { %v2584_v35 = vmul.f32 0.125, %v2578_v31  ;;  %v2587_v33 = vmul.f32 %v2581_v32, %v2581_v32 }
 0x238   :  { %v2590_v34 = vsub.f32 %v2584_v35, %v2587_v33 }
 0x23a   :  { %v2593_v39 = vmax.f32 %v2590_v34, 0.0 }
 0x23c   :  { %v2596_v40 = vadd.f32 1e-05, %v2593_v39 }
 0x23e   :  { %3986 = vrsqrt.f32 %v2596_v40 }
 0x24b   :  { %v3987_v46 = vpop.eup %3986 }
 0x24c   :  { %v2617_v49 = vrot.slane %v3987_v46, %v2609_v45 }
 0x24e   :  { %v2618_v52 = vcombine.low %v2610_v48, %v2617_v49 }
 0x250   :  { %v2625_v54 = vrot.slane %v2618_v52, %v2609_v45  ;;  %v2975_v52 = vld [vmem:[#allocation9] sm:$0x1] }
 0x252   :  { %v2627_v16 = vmul.f32 %v2625_v54, %v2537_v53 }
 0x254   :  { %v2632_v17 = vrot.slane %v2627_v16, %v4264_v55  ;;  %v2636_v56 = vrot.slane %v2627_v16, %v2635_v51  ;;  %v2640_v57 = vrot.slane %v2627_v16, %v2639_v38 }
 0x256   :  { %v2644_v58 = vmul.f32 %v2632_v17, %v4253_v18  ;;  %v2645_v59 = vmul.f32 %v2636_v56, %v4258_v36  ;;  %v2646_v60 = vmul.f32 %v2640_v57, %v2581_v32  ;;  %v2676_v47 = vmul.f32 %v2636_v56, %v4243_v50 }
 0x257   :  { %v2675_v61 = vmul.f32 %v2632_v17, %v4238_v22  ;;  %v2677_v4 = vmul.f32 %v2640_v57, %v2532_v14 }
 0x258   :  { %v2650_v62 = vcombine.low %v2644_v58, %v2645_v59  ;;  %v2664_v25 = vrot.slane %v2646_v60, %v2609_v45  ;;  %v3364_v59 = vld [vmem:[#allocation9 + $0x2] ss:$0 sm:$0xff] }
 0x25a   :  { %v2657_v63 = vrot.slane %v2650_v62, %v2609_v45 }
 0x25c   :  { %v2665_v26 = vcombine.low %v2657_v63, %v2664_v25 }
 0x25e   :  { %v2672_v1 = vrot.slane %v2665_v26, %v2609_v45 }
 0x260   :  { %v2674_v2 = vsub.f32 %v2539_v0, %v2672_v1 }
 0x262   :  { %v2686_v3 = vrot.slane %v2674_v2, %v2635_v51  ;;  %v2690_v5 = vrot.slane %v2674_v2, %v2639_v38  ;;  %v2682_v8 = vrot.slane %v2674_v2, %v4264_v55  ;;  %v2976_v51 = vld [vmem:[#allocation9 + $0x1] sm:$0x1] }
 0x264   :  { %v2695_v18 = vadd.f32 %v2686_v3, %v2676_v47  ;;  %v2696_v9 = vadd.f32 %v2690_v5, %v2677_v4  ;;  %v2694_v36 = vadd.f32 %v2682_v8, %v2675_v61  ;;  %v3365_v61 = vld [vmem:[#allocation9 + $0x3] ss:$0 sm:$0xff] }
 0x266   :  { %v2698_v10 = vmax.f32 %v2695_v18, 0.0  ;;  %v2699_v11 = vmax.f32 %v2696_v9, 0.0  ;;  %v2697_v50 = vmax.f32 %v2694_v36, 0.0 }
 0x268   :  { %v2701_v12 = vpack.c.bf16 %v2698_v10, %v2698_v10  ;;  %v2702_v22 = vpack.c.bf16 %v2699_v11, %v2699_v11  ;;  %v2700_v13 = vpack.c.bf16 %v2697_v50, %v2697_v50 }
 0x26a   :  { %2927 = vmatprep.mubr.bf16.mxu0 %v2701_v12  ;;  %3547 = vmatmul.mubr.bf16.vlgmr.msra.gmra.mxu1 %v2702_v22 }
 0x26b   :  { %2928 = vmatmul.mubr.bf16.vlgmr.msra.gmra.mxu0 %v2700_v13 }
 0x32a   :  { %v2969_v15 = vpop.f32.mrf.mxu1 }
 0x32b   :  { %v3515_v19 = vpop.f32.mrf.mxu0 }
 0x32c   :  { %v3548_v6 = vpop.f32.mrf.mxu1 }
 0x32d   :  { %v3516_v7 = vpop.f32.mrf.mxu0 }
 0x32e   :  { %v3517_v14 = vadd.f32 %v3516_v7, %v3515_v19  ;;  %v2972_v20 = vpop.f32.mrf.mxu1 }
 0x32f   :  { %v3518_v21 = vpop.f32.mrf.mxu0 }
 0x330   :  { %v2970_v24 = vadd.f32 %v3517_v14, %v2969_v15  ;;  %v3549_v27 = vpop.f32.mrf.mxu1 }
 0x331   :  { %v3519_v28 = vpop.f32.mrf.mxu0 }
 0x332   :  { %v2977_v37 = vrot.slane %v2970_v24, 4  ;;  %v2983_v29 = vmul.f32 %v2970_v24, %v2970_v24 }
 0x334   :  { %v2978_v30 = vadd.f32 %v2977_v37, %v2970_v24  ;;  %v2984_v31 = vrot.slane %v2983_v29, 4 }
 0x336   :  { %v2979_v32 = vrot.slane %v2978_v30, 2  ;;  %v2985_v35 = vadd.f32 %v2984_v31, %v2983_v29 }
 0x338   :  { %v2980_v33 = vadd.f32 %v2979_v32, %v2978_v30  ;;  %v2986_v34 = vrot.slane %v2985_v35, 2 }
 0x33a   :  { %v2987_v39 = vadd.f32 %v2986_v34, %v2985_v35  ;;  %v2981_v40 = vrot.slane %v2980_v33, 1 }
 0x33c   :  { %v2988_v41 = vrot.slane %v2987_v39, 1  ;;  %v2982_v42 = vadd.f32 %v2981_v40, %v2980_v33 }
 0x33e   :  { %v2989_v43 = vadd.f32 %v2988_v41, %v2987_v39  ;;  %v2990_v23 = vmul.f32 0.125, %v2982_v42 }
 0x340   :  { %v2991_v44 = vmul.f32 0.125, %v2989_v43  ;;  %v2992_v45 = vmul.f32 %v2990_v23, %v2990_v23 }
 0x342   :  { %v2993_v46 = vsub.f32 %v2991_v44, %v2992_v45 }
 0x344   :  { %v2994_v48 = vmax.f32 %v2993_v46, 0.0 }
 0x346   :  { %v2995_v49 = vadd.f32 1e-05, %v2994_v48 }
 0x348   :  { %3988 = vrsqrt.f32 %v2995_v49 }
 0x355   :  { %v3989_v53 = vpop.eup %3988 }
 0x356   :  { %v2997_v54 = vmul.f32 %v3989_v53, %v2975_v52 }
 0x358   :  { %v2998_v38 = vmul.f32 %v2997_v54, %v2990_v23  ;;  %v3003_v16 = vrot.slane %v2997_v54, %v4264_v55 }
 0x35a   :  { %v2999_v17 = vsub.f32 %v2976_v51, %v2998_v38  ;;  %v3004_v56 = vmul.f32 %v3003_v16, %v2970_v24 }
 0x35c   :  { %v3008_v57 = vrot.slane %v2999_v17, %v4264_v55 }
 0x35e   :  { %v3009_v58 = vadd.f32 %v3008_v57, %v3004_v56 }
 0x360   :  { %v3010_v60 = vmax.f32 %v3009_v58, 0.0 }
 0x362   :  { %v3017_v47 = vmul.f32 %v3364_v59, %v3010_v60 }
 0x364   :  { %3018 = vadd.xlane.f32.xlu0 %v3017_v47 }
 0x3ed   :  { %v3019_v62 = vpop.xlane.xlu0 %3018 }
 0x3ee   :  { %v3024_v63 = vadd.f32 %v3365_v61, %v3019_v62 }
 0x3f0   :  { %v3366_v25 = vmul.f32 -1.442695, %v3024_v63 }
 0x3f2   :  { %3990 = vpow2.f32 %v3366_v25 }
 0x3ff   :  { %v3991_v26 = vpop.eup %3990 }
 0x400   :  { %v3028_v0 = vadd.f32 1.0, %v3991_v26 }
 0x402   :  { %3992 = vrcp.f32 %v3028_v0 }
 0x40f   :  { %v3993_v1 = vpop.eup %3992 }
 0x410   :  { %3032 = vst.msk [vmem:[%s4282_s5] sm:$0xff] %vm3031_vm1, %v3993_v1 }
 0x411   :  { %3037 = vsyncpa [#allocation3], 1 }
 0x412   :  { %3038 = vsyncpa [#allocation5], 1 }
 0x413   :  { %3039 = vsyncpa [#allocation8], 1 }

</bundles_post_ra>
